<compile_context>
chip_gen: v7x
topology: tpu7x:2x2x1
jax: 0.10.0
libtpu: 0.0.40
codegen_flags: <defaults>
</compile_context>

<pallas_src>
import functools
import math

import jax
import jax.numpy as jnp
from jax import lax
from jax.experimental import pallas as pl
from jax.experimental.pallas import tpu as pltpu


def _round_up(n, m):
    return (n + m - 1) // m * m


def _pad2(a, rows, cols):
    return jnp.pad(a, ((0, rows - a.shape[0]), (0, cols - a.shape[1])))


def mlp_kernel(x_ref, w1_ref, b1_ref, w2_ref, b2_ref, w3_ref, b3_ref,
               w4_ref, b4_ref, out_ref, *, n_classes):
    # fc1 + relu  (bf16 operands on the MXU, fp32 accumulation)
    h = jnp.dot(x_ref[...], w1_ref[...], preferred_element_type=jnp.float32)
    h = jnp.maximum(h + b1_ref[...], 0.0)
    # fc2 + relu
    h = jnp.dot(h.astype(jnp.bfloat16), w2_ref[...],
                preferred_element_type=jnp.float32)
    h = jnp.maximum(h + b2_ref[...], 0.0)
    # fc3 + relu
    h = jnp.dot(h.astype(jnp.bfloat16), w3_ref[...],
                preferred_element_type=jnp.float32)
    h = jnp.maximum(h + b3_ref[...], 0.0)
    # fc4
    logits = jnp.dot(h.astype(jnp.bfloat16), w4_ref[...],
                     preferred_element_type=jnp.float32) + b4_ref[...]

    # Only the first n_classes lanes are real classes; the rest are zero pad.
    col = lax.broadcasted_iota(jnp.int32, logits.shape, 1)
    valid = col < n_classes

    # softmax over dim=1, restricted to the real classes
    masked = jnp.where(valid, logits, -jnp.inf)
    m = jnp.max(masked, axis=-1, keepdims=True)
    e = jnp.exp(masked - m)                          # padded lanes -> exp(-inf) = 0
    p = e * pl.reciprocal(jnp.sum(e, axis=-1, keepdims=True), approx=False)

    # log_softmax applied to the softmax output (matches the PyTorch module).
    # p is in [0, 1] and sums to 1, so no max-shift is needed.
    ep = jnp.where(valid, jnp.exp(p), 0.0)
    lse = jnp.log(jnp.sum(ep, axis=-1, keepdims=True))
    out_ref[...] = p - lse                           # padded lanes sliced off in wrapper


def mlp_forward(x, params, *, batch_tile=256):
    (w1, b1), (w2, b2), (w3, b3), (w4, b4) = params
    B, d_in = x.shape
    n_classes = w4.shape[1]

    # Pad every width to a multiple of 128 (lane-aligned MXU tiles).
    dp = _round_up(d_in, 128)          # 748 -> 768
    h1 = _round_up(w1.shape[1], 128)   # 500 -> 512
    h2 = _round_up(w2.shape[1], 128)   # 200 -> 256
    h3 = _round_up(w3.shape[1], 128)   # 100 -> 128
    op = _round_up(n_classes, 128)     #  10 -> 128

    tb = min(batch_tile, _round_up(B, 8))
    bp = _round_up(B, tb)

    # Weights / x in bf16 (halves HBM weight bytes, native MXU rate); biases fp32.
    xp = _pad2(x, bp, dp).astype(jnp.bfloat16)
    w1p = _pad2(w1, dp, h1).astype(jnp.bfloat16)
    w2p = _pad2(w2, h1, h2).astype(jnp.bfloat16)
    w3p = _pad2(w3, h2, h3).astype(jnp.bfloat16)
    w4p = _pad2(w4, h3, op).astype(jnp.bfloat16)
    b1p = _pad2(b1.reshape(1, -1), 1, h1).astype(jnp.float32)
    b2p = _pad2(b2.reshape(1, -1), 1, h2).astype(jnp.float32)
    b3p = _pad2(b3.reshape(1, -1), 1, h3).astype(jnp.float32)
    b4p = _pad2(b4.reshape(1, -1), 1, op).astype(jnp.float32)

    # Weights use a constant index_map -> stay VMEM-resident across batch tiles.
    const = lambda shape: pl.BlockSpec(shape, lambda i: (0, 0))

    out = pl.pallas_call(
        functools.partial(mlp_kernel, n_classes=n_classes),
        out_shape=jax.ShapeDtypeStruct((bp, op), jnp.float32),
        grid=(bp // tb,),
        in_specs=[
            pl.BlockSpec((tb, dp), lambda i: (i, 0)),   # x: tiled over batch
            const((dp, h1)), const((1, h1)),
            const((h1, h2)), const((1, h2)),
            const((h2, h3)), const((1, h3)),
            const((h3, op)), const((1, op)),
        ],
        out_specs=pl.BlockSpec((tb, op), lambda i: (i, 0)),
        compiler_params=pltpu.CompilerParams(
            dimension_semantics=("parallel",)),          # sharded across TCs on v7x
    )(xp, w1p, b1p, w2p, b2p, w3p, b3p, w4p, b4p)

    return out[:B, :n_classes]


def init_linear(key, fan_in, fan_out):
    # PyTorch nn.Linear default init: U(-1/sqrt(fan_in), 1/sqrt(fan_in)).
    # Weights stored transposed vs PyTorch: (in_features, out_features).
    kw, kb = jax.random.split(key)
    bound = 1.0 / math.sqrt(fan_in)
    w = jax.random.uniform(kw, (fan_in, fan_out), jnp.float32, -bound, bound)
    b = jax.random.uniform(kb, (fan_out,), jnp.float32, -bound, bound)
    return w, b


def reference_forward_bf16(x, params):
    """JAX reference using the same bf16-operand / fp32-accumulate recipe as the kernel."""
    h = x.astype(jnp.bfloat16)
    for i, (w, b) in enumerate(params):
        h = jnp.dot(h, w.astype(jnp.bfloat16),
                    preferred_element_type=jnp.float32) + b
        if i < 3:
            h = jnp.maximum(h, 0.0).astype(jnp.bfloat16)
    p = jax.nn.softmax(h, axis=1)
    return jax.nn.log_softmax(p, axis=1)


def reference_forward_f32(x, params):
    """Pure fp32 reference (module semantics check)."""
    h = x
    for i, (w, b) in enumerate(params):
        h = h @ w + b
        if i < 3:
            h = jnp.maximum(h, 0.0)
    p = jax.nn.softmax(h, axis=1)
    return jax.nn.log_softmax(p, axis=1)


if __name__ == "__main__":
    key = jax.random.PRNGKey(0)
    k_x, k1, k2, k3, k4 = jax.random.split(key, 5)

    B = 8
    x = jax.random.normal(k_x, (B, 748), jnp.float32)

    params = [
        init_linear(k1, 748, 500),
        init_linear(k2, 500, 200),
        init_linear(k3, 200, 100),
        init_linear(k4, 100, 10),
    ]

    out = jax.block_until_ready(mlp_forward(x, params))
    assert out.shape == (B, 10)
    assert bool(jnp.all(jnp.isfinite(out)))

    ref_bf16 = reference_forward_bf16(x, params)
    ref_f32 = reference_forward_f32(x, params)
    assert jnp.allclose(out, ref_bf16, atol=1e-4, rtol=1e-4), "mismatch vs bf16 reference"
    assert jnp.allclose(out, ref_f32, atol=5e-2, rtol=5e-2), "mismatch vs fp32 reference"

    print("KERNEL_OK")
</pallas_src>

<mosaic_0001>
module attributes {stable_mosaic.version = 11 : i64} {
  func.func @mlp_kernel(%arg0: i32, %arg1: memref<8x768xbf16, #tpu.memory_space<vmem>>, %arg2: memref<768x512xbf16, #tpu.memory_space<vmem>>, %arg3: memref<1x512xf32, #tpu.memory_space<vmem>>, %arg4: memref<512x256xbf16, #tpu.memory_space<vmem>>, %arg5: memref<1x256xf32, #tpu.memory_space<vmem>>, %arg6: memref<256x128xbf16, #tpu.memory_space<vmem>>, %arg7: memref<1x128xf32, #tpu.memory_space<vmem>>, %arg8: memref<128x128xbf16, #tpu.memory_space<vmem>>, %arg9: memref<1x128xf32, #tpu.memory_space<vmem>>, %arg10: memref<8x128xf32, #tpu.memory_space<vmem>>) attributes {dimension_semantics = [#tpu.dimension_semantics<parallel>], iteration_bounds = array<i64: 1>, scalar_prefetch = 0 : i64, scratch_operands = 0 : i64, tpu.core_type = #tpu.core_type<tc>, window_params = [{transform_indices = @transform_0, window_bounds = array<i64: 8, 768>}, {pipeline_mode = #tpu.pipeline_mode<synchronous>, transform_indices = @transform_1, window_bounds = array<i64: 768, 512>}, {pipeline_mode = #tpu.pipeline_mode<synchronous>, transform_indices = @transform_2, window_bounds = array<i64: 1, 512>}, {pipeline_mode = #tpu.pipeline_mode<synchronous>, transform_indices = @transform_3, window_bounds = array<i64: 512, 256>}, {pipeline_mode = #tpu.pipeline_mode<synchronous>, transform_indices = @transform_4, window_bounds = array<i64: 1, 256>}, {pipeline_mode = #tpu.pipeline_mode<synchronous>, transform_indices = @transform_5, window_bounds = array<i64: 256, 128>}, {pipeline_mode = #tpu.pipeline_mode<synchronous>, transform_indices = @transform_6, window_bounds = array<i64: 1, 128>}, {pipeline_mode = #tpu.pipeline_mode<synchronous>, transform_indices = @transform_7, window_bounds = array<i64: 128, 128>}, {pipeline_mode = #tpu.pipeline_mode<synchronous>, transform_indices = @transform_8, window_bounds = array<i64: 1, 128>}, {transform_indices = @transform_9, window_bounds = array<i64: 8, 128>}]} {
    %c0 = arith.constant 0 : index
    %c0_0 = arith.constant 0 : index
    %0 = vector.load %arg1[%c0, %c0_0] : memref<8x768xbf16, #tpu.memory_space<vmem>>, vector<8x768xbf16>
    %c0_1 = arith.constant 0 : index
    %c0_2 = arith.constant 0 : index
    %1 = vector.load %arg2[%c0_1, %c0_2] : memref<768x512xbf16, #tpu.memory_space<vmem>>, vector<768x512xbf16>
    %cst = arith.constant dense<0.000000e+00> : vector<8x512xf32>
    %2 = tpu.matmul %0, %1, %cst {dimension_numbers = #tpu.dot_dimension_numbers<[1], [0], [0], [1], [0, 0, 1, 1], [], []>} : vector<8x768xbf16>, vector<768x512xbf16>, vector<8x512xf32> -> vector<8x512xf32>
    %c0_3 = arith.constant 0 : index
    %c0_4 = arith.constant 0 : index
    %3 = vector.load %arg3[%c0_3, %c0_4] : memref<1x512xf32, #tpu.memory_space<vmem>>, vector<1x512xf32>
    %4 = vector.broadcast %3 : vector<1x512xf32> to vector<8x512xf32>
    %5 = arith.addf %2, %4 : vector<8x512xf32>
    %cst_5 = arith.constant 0.000000e+00 : f32
    %6 = vector.broadcast %cst_5 : f32 to vector<8x512xf32>
    %7 = arith.maximumf %5, %6 : vector<8x512xf32>
    %8 = arith.truncf %7 : vector<8x512xf32> to vector<8x512xbf16>
    %c0_6 = arith.constant 0 : index
    %c0_7 = arith.constant 0 : index
    %9 = vector.load %arg4[%c0_6, %c0_7] : memref<512x256xbf16, #tpu.memory_space<vmem>>, vector<512x256xbf16>
    %cst_8 = arith.constant dense<0.000000e+00> : vector<8x256xf32>
    %10 = tpu.matmul %8, %9, %cst_8 {dimension_numbers = #tpu.dot_dimension_numbers<[1], [0], [0], [1], [0, 0, 1, 1], [], []>} : vector<8x512xbf16>, vector<512x256xbf16>, vector<8x256xf32> -> vector<8x256xf32>
    %c0_9 = arith.constant 0 : index
    %c0_10 = arith.constant 0 : index
    %11 = vector.load %arg5[%c0_9, %c0_10] : memref<1x256xf32, #tpu.memory_space<vmem>>, vector<1x256xf32>
    %12 = vector.broadcast %11 : vector<1x256xf32> to vector<8x256xf32>
    %13 = arith.addf %10, %12 : vector<8x256xf32>
    %cst_11 = arith.constant 0.000000e+00 : f32
    %14 = vector.broadcast %cst_11 : f32 to vector<8x256xf32>
    %15 = arith.maximumf %13, %14 : vector<8x256xf32>
    %16 = arith.truncf %15 : vector<8x256xf32> to vector<8x256xbf16>
    %c0_12 = arith.constant 0 : index
    %c0_13 = arith.constant 0 : index
    %17 = vector.load %arg6[%c0_12, %c0_13] : memref<256x128xbf16, #tpu.memory_space<vmem>>, vector<256x128xbf16>
    %cst_14 = arith.constant dense<0.000000e+00> : vector<8x128xf32>
    %18 = tpu.matmul %16, %17, %cst_14 {dimension_numbers = #tpu.dot_dimension_numbers<[1], [0], [0], [1], [0, 0, 1, 1], [], []>} : vector<8x256xbf16>, vector<256x128xbf16>, vector<8x128xf32> -> vector<8x128xf32>
    %c0_15 = arith.constant 0 : index
    %c0_16 = arith.constant 0 : index
    %19 = vector.load %arg7[%c0_15, %c0_16] : memref<1x128xf32, #tpu.memory_space<vmem>>, vector<1x128xf32>
    %20 = vector.broadcast %19 : vector<1x128xf32> to vector<8x128xf32>
    %21 = arith.addf %18, %20 : vector<8x128xf32>
    %cst_17 = arith.constant 0.000000e+00 : f32
    %22 = vector.broadcast %cst_17 : f32 to vector<8x128xf32>
    %23 = arith.maximumf %21, %22 : vector<8x128xf32>
    %24 = arith.truncf %23 : vector<8x128xf32> to vector<8x128xbf16>
    %c0_18 = arith.constant 0 : index
    %c0_19 = arith.constant 0 : index
    %25 = vector.load %arg8[%c0_18, %c0_19] : memref<128x128xbf16, #tpu.memory_space<vmem>>, vector<128x128xbf16>
    %cst_20 = arith.constant dense<0.000000e+00> : vector<8x128xf32>
    %26 = tpu.matmul %24, %25, %cst_20 {dimension_numbers = #tpu.dot_dimension_numbers<[1], [0], [0], [1], [0, 0, 1, 1], [], []>} : vector<8x128xbf16>, vector<128x128xbf16>, vector<8x128xf32> -> vector<8x128xf32>
    %c0_21 = arith.constant 0 : index
    %c0_22 = arith.constant 0 : index
    %27 = vector.load %arg9[%c0_21, %c0_22] : memref<1x128xf32, #tpu.memory_space<vmem>>, vector<1x128xf32>
    %28 = vector.broadcast %27 : vector<1x128xf32> to vector<8x128xf32>
    %29 = arith.addf %26, %28 : vector<8x128xf32>
    %30 = tpu.iota {dimensions = array<i32: 1>} : vector<8x128xi32>
    %c10_i32 = arith.constant 10 : i32
    %31 = vector.broadcast %c10_i32 : i32 to vector<8x128xi32>
    %32 = arith.cmpi slt, %30, %31 : vector<8x128xi32>
    %cst_23 = arith.constant 0xFF800000 : f32
    %33 = vector.broadcast %cst_23 : f32 to vector<8x128xf32>
    %34 = arith.select %32, %29, %33 : vector<8x128xi1>, vector<8x128xf32>
    %cst_24 = arith.constant dense<0xFF800000> : vector<8xf32>
    %35 = vector.multi_reduction <maximumf>, %34, %cst_24 [1] : vector<8x128xf32> to vector<8xf32>
    %36 = vector.shape_cast %35 : vector<8xf32> to vector<8x1xf32>
    %37 = vector.broadcast %36 : vector<8x1xf32> to vector<8x128xf32>
    %38 = arith.subf %34, %37 : vector<8x128xf32>
    %39 = math.exp %38 : vector<8x128xf32>
    %cst_25 = arith.constant dense<0.000000e+00> : vector<8xf32>
    %40 = vector.multi_reduction <add>, %39, %cst_25 [1] : vector<8x128xf32> to vector<8xf32>
    %41 = vector.shape_cast %40 : vector<8xf32> to vector<8x1xf32>
    %42 = tpu.reciprocal %41 : vector<8x1xf32> -> vector<8x1xf32>
    %43 = vector.broadcast %42 : vector<8x1xf32> to vector<8x128xf32>
    %44 = arith.mulf %39, %43 : vector<8x128xf32>
    %45 = math.exp %44 : vector<8x128xf32>
    %cst_26 = arith.constant 0.000000e+00 : f32
    %46 = vector.broadcast %cst_26 : f32 to vector<8x128xf32>
    %47 = arith.select %32, %45, %46 : vector<8x128xi1>, vector<8x128xf32>
    %cst_27 = arith.constant dense<0.000000e+00> : vector<8xf32>
    %48 = vector.multi_reduction <add>, %47, %cst_27 [1] : vector<8x128xf32> to vector<8xf32>
    %49 = vector.shape_cast %48 : vector<8xf32> to vector<8x1xf32>
    %50 = math.log %49 : vector<8x1xf32>
    %51 = vector.broadcast %50 : vector<8x1xf32> to vector<8x128xf32>
    %52 = arith.subf %44, %51 : vector<8x128xf32>
    %c0_28 = arith.constant 0 : index
    %c0_29 = arith.constant 0 : index
    %53 = vector.load %arg10[%c0_28, %c0_29] : memref<8x128xf32, #tpu.memory_space<vmem>>, vector<8x128xf32>
    tpu.vector_store %arg10[%c0_28, %c0_29], %52 {strides = array<i32>} : memref<8x128xf32, #tpu.memory_space<vmem>>, vector<8x128xf32>,
    return
  }
  func.func @transform_0(%arg0: i32) -> (i32, i32) {
    %c0_i32 = arith.constant 0 : i32
    %c0_i32_0 = arith.constant 0 : i32
    return %arg0, %c0_i32 : i32, i32
  }
  func.func @transform_1(%arg0: i32) -> (i32, i32) {
    %c0_i32 = arith.constant 0 : i32
    %c0_i32_0 = arith.constant 0 : i32
    %c0_i32_1 = arith.constant 0 : i32
    return %c0_i32, %c0_i32_0 : i32, i32
  }
  func.func @transform_2(%arg0: i32) -> (i32, i32) {
    %c0_i32 = arith.constant 0 : i32
    %c0_i32_0 = arith.constant 0 : i32
    %c0_i32_1 = arith.constant 0 : i32
    return %c0_i32, %c0_i32_0 : i32, i32
  }
  func.func @transform_3(%arg0: i32) -> (i32, i32) {
    %c0_i32 = arith.constant 0 : i32
    %c0_i32_0 = arith.constant 0 : i32
    %c0_i32_1 = arith.constant 0 : i32
    return %c0_i32, %c0_i32_0 : i32, i32
  }
  func.func @transform_4(%arg0: i32) -> (i32, i32) {
    %c0_i32 = arith.constant 0 : i32
    %c0_i32_0 = arith.constant 0 : i32
    %c0_i32_1 = arith.constant 0 : i32
    return %c0_i32, %c0_i32_0 : i32, i32
  }
  func.func @transform_5(%arg0: i32) -> (i32, i32) {
    %c0_i32 = arith.constant 0 : i32
    %c0_i32_0 = arith.constant 0 : i32
    %c0_i32_1 = arith.constant 0 : i32
    return %c0_i32, %c0_i32_0 : i32, i32
  }
  func.func @transform_6(%arg0: i32) -> (i32, i32) {
    %c0_i32 = arith.constant 0 : i32
    %c0_i32_0 = arith.constant 0 : i32
    %c0_i32_1 = arith.constant 0 : i32
    return %c0_i32, %c0_i32_0 : i32, i32
  }
  func.func @transform_7(%arg0: i32) -> (i32, i32) {
    %c0_i32 = arith.constant 0 : i32
    %c0_i32_0 = arith.constant 0 : i32
    %c0_i32_1 = arith.constant 0 : i32
    return %c0_i32, %c0_i32_0 : i32, i32
  }
  func.func @transform_8(%arg0: i32) -> (i32, i32) {
    %c0_i32 = arith.constant 0 : i32
    %c0_i32_0 = arith.constant 0 : i32
    %c0_i32_1 = arith.constant 0 : i32
    return %c0_i32, %c0_i32_0 : i32, i32
  }
  func.func @transform_9(%arg0: i32) -> (i32, i32) {
    %c0_i32 = arith.constant 0 : i32
    %c0_i32_0 = arith.constant 0 : i32
    return %arg0, %c0_i32 : i32, i32
  }
}

</mosaic_0001>

<bundles_post_ra>
// kernel: tpu_custom_call.1
= control target key start
LH: loop header
LB: loop body
LE: loop exit
PB: predicated region body
PF: predicated region fallthrough
CT: control target
= control target key end

     0   :  { %14 = vsyncpa [#allocation3], 0  ;;  %s3502_s0 = inlined_call_operand.hbm [shape: bf16[8,768], index: 0, kind: input, shape index: {}]   ;;  %s3503_s1 = inlined_call_operand.hbm [shape: bf16[768,512], index: 1, kind: input, shape index: {}]   ;;  %s3504_s2 = inlined_call_operand.vmem [shape: f32[1,512], index: 2, kind: input, shape index: {}]   ;;  %s3505_s3 = inlined_call_operand.hbm [shape: bf16[512,256], index: 3, kind: input, shape index: {}]   ;;  %s3506_s4 = inlined_call_operand.vmem [shape: f32[1,256], index: 4, kind: input, shape index: {}]   ;;  %s3507_s5 = inlined_call_operand.hbm [shape: bf16[256,128], index: 5, kind: input, shape index: {}]   ;;  %s3508_s6 = inlined_call_operand.vmem [shape: f32[1,128], index: 6, kind: input, shape index: {}]   ;;  %s3509_s7 = inlined_call_operand.hbm [shape: bf16[128,128], index: 7, kind: input, shape index: {}]   ;;  %s3510_s8 = inlined_call_operand.vmem [shape: f32[1,128], index: 8, kind: input, shape index: {}]   ;;  %s3511_s9 = inlined_call_operand.hbm [shape: f32[8,128], index: 9, kind: output, shape index: {}]  }
   0x1   :  { %15 = vsyncpa [#allocation6], 0 }
   0x2   :  { %16 = vsyncpa [#allocation9], 0 }
   0x3   :  { %17 = vsyncpa [#allocation4], 0  ;;  %s3302_s30 = smov [#allocation5]   ;;  %s3162_s13 = scalar_lea.hbm %s3503_s1, 24576 }
   0x4   :  { %s33_s10 = sshll.u32 %s3302_s30, 4  ;;  %p3163_p0 = scmp.ne.s32.totalorder %s3503_s1, %s3162_s13  ;;  %s34_s10 = int_to_ptr.vmem [resolvable:$true] %s33_s10 }
   0x5   :  { %p3166_p1 = scmp.lt.u32.totalorder %s3162_s13, %s3503_s1 }
   0x7   :  { %p3168_p2 = pnand %p3166_p1, %p3163_p0 }
   0x9   :  { %3171 = shalt.err (!%p3168_p2)
}
   0xa   :  { %s3172_s18 = scalar_lea.vmem %s34_s10, 24576  ;;  %p3177_p4 = scmp.lt.s32.totalorder %s34_s10, %s34_s10 }
   0xb   :  { %p3173_p3 = scmp.ne.s32.totalorder %s34_s10, %s3172_s18  ;;  %p3178_p5 = scmp.lt.s32.totalorder %s3172_s18, %s3172_s18 }
   0xd   :  { %p3179_p6 = por %p3178_p5, %p3177_p4 }
   0xf   :  { %p3180_p7 = pnand %p3179_p6, %p3173_p3 }
  0x11   :  { %3183 = shalt.err (!%p3180_p7)
}
  0x12   :  { %s3303_s19 = smov 256   ;;  %s3304_s20 = smov 16  }
  0x13   :  { %39 = dma.hbm_to_vmem [thread:$0]  %s3503_s1, 24576, %s34_s10, [#allocation6], %s3303_s19, %s3303_s19, %s3304_s20  }
  0x14   :  { %s3305_s23 = smov [#allocation8]   ;;  %s3184_s27 = scalar_lea.hbm %s3507_s5, 2048 }
  0x15   :  { %s61_s24 = sshll.u32 %s3305_s23, 4  ;;  %p3185_p8 = scmp.ne.s32.totalorder %s3507_s5, %s3184_s27  ;;  %s62_s24 = int_to_ptr.vmem [resolvable:$true] %s61_s24 }
  0x16   :  { %p3188_p9 = scmp.lt.u32.totalorder %s3184_s27, %s3507_s5 }
  0x18   :  { %p3190_p10 = pnand %p3188_p9, %p3185_p8 }
  0x1a   :  { %3193 = shalt.err (!%p3190_p10)
}
  0x1b   :  { %s3194_s12 = scalar_lea.vmem %s62_s24, 2048  ;;  %p3199_p12 = scmp.lt.s32.totalorder %s62_s24, %s62_s24 }
  0x1c   :  { %p3195_p11 = scmp.ne.s32.totalorder %s62_s24, %s3194_s12  ;;  %p3200_p13 = scmp.lt.s32.totalorder %s3194_s12, %s3194_s12 }
  0x1e   :  { %p3201_p0 = por %p3200_p13, %p3199_p12 }
  0x20   :  { %p3202_p1 = pnand %p3201_p0, %p3195_p11 }
  0x22   :  { %3205 = shalt.err (!%p3202_p1)
}
  0x23   :  { %s3306_s1 = smov 64   ;;  %s3307_s10 = smov 4  }
  0x24   :  { %67 = dma.hbm_to_vmem [thread:$0]  %s3507_s5, 2048, %s62_s24, [#allocation9], %s3306_s1, %s3306_s1, %s3307_s10  }
  0x25   :  { %s3308_s15 = smov [#allocation2]   ;;  %s3309_s17 = smov [#allocation7]  }
  0x26   :  { %s24_s16 = sshll.u32 %s3308_s15, 4  ;;  %s47_s18 = sshll.u32 %s3309_s17, 4  ;;  %s25_s16 = int_to_ptr.vmem [resolvable:$true] %s24_s16  ;;  %s3393_s18 = int_to_ptr.vmem [resolvable:$true] %s47_s18 }
  0x27   :  { %s3206_s21 = scalar_lea.hbm %s3502_s0, 384 }
  0x28   :  { %p3207_p2 = scmp.ne.s32.totalorder %s3502_s0, %s3206_s21  ;;  %p3210_p3 = scmp.lt.u32.totalorder %s3206_s21, %s3502_s0 }
  0x2a   :  { %p3212_p4 = pnand %p3210_p3, %p3207_p2 }
  0x2c   :  { %3215 = shalt.err (!%p3212_p4)
}
  0x2d   :  { %s3216_s5 = scalar_lea.vmem %s25_s16, 384  ;;  %p3221_p6 = scmp.lt.s32.totalorder %s25_s16, %s25_s16 }
  0x2e   :  { %p3217_p5 = scmp.ne.s32.totalorder %s25_s16, %s3216_s5  ;;  %p3222_p7 = scmp.lt.s32.totalorder %s3216_s5, %s3216_s5 }
  0x30   :  { %p3223_p8 = por %p3222_p7, %p3221_p6 }
  0x32   :  { %p3224_p9 = pnand %p3223_p8, %p3217_p5 }
  0x34   :  { %3227 = shalt.err (!%p3224_p9)
}
  0x35   :  { %27 = dma.hbm_to_vmem [thread:$0]  %s3502_s0, 384, %s25_s16, [#allocation3]  }
  0x36   :  { %s3228_s30 = scalar_lea.hbm %s3505_s3, 8192 }
  0x37   :  { %p3229_p10 = scmp.ne.s32.totalorder %s3505_s3, %s3228_s30  ;;  %p3232_p11 = scmp.lt.u32.totalorder %s3228_s30, %s3505_s3 }
  0x39   :  { %p3234_p12 = pnand %p3232_p11, %p3229_p10 }
  0x3b   :  { %3237 = shalt.err (!%p3234_p12)
}
  0x3c   :  { %s3238_s15 = scalar_lea.vmem %s3393_s18, 8192  ;;  %p3243_p0 = scmp.lt.s32.totalorder %s3393_s18, %s3393_s18 }
  0x3d   :  { %p3239_p13 = scmp.ne.s32.totalorder %s3393_s18, %s3238_s15  ;;  %p3244_p1 = scmp.lt.s32.totalorder %s3238_s15, %s3238_s15 }
  0x3f   :  { %p3245_p2 = por %p3244_p1, %p3243_p0 }
  0x41   :  { %p3246_p3 = pnand %p3245_p2, %p3239_p13 }
  0x43   :  { %3249 = shalt.err (!%p3246_p3)
}
  0x44   :  { %s3310_s0 = smov 128   ;;  %s3311_s16 = smov 8  }
  0x45   :  { %53 = dma.hbm_to_vmem [thread:$0]  %s3505_s3, 8192, %s3393_s18, [#allocation6], %s3310_s0, %s3310_s0, %s3311_s16  }
  0x46   :  { %s3312_s20 = smov [#allocation10]   ;;  %s3250_s25 = scalar_lea.hbm %s3509_s7, 1024 }
  0x47   :  { %s75_s21 = sshll.u32 %s3312_s20, 4  ;;  %p3251_p4 = scmp.ne.s32.totalorder %s3509_s7, %s3250_s25  ;;  %s76_s21 = int_to_ptr.vmem [resolvable:$true] %s75_s21 }
  0x48   :  { %p3254_p5 = scmp.lt.u32.totalorder %s3250_s25, %s3509_s7 }
  0x4a   :  { %p3256_p6 = pnand %p3254_p5, %p3251_p4 }
  0x4c   :  { %3259 = shalt.err (!%p3256_p6)
}
  0x4d   :  { %s3260_s28 = scalar_lea.vmem %s76_s21, 1024  ;;  %p3265_p8 = scmp.lt.s32.totalorder %s76_s21, %s76_s21 }
  0x4e   :  { %p3261_p7 = scmp.ne.s32.totalorder %s76_s21, %s3260_s28  ;;  %p3266_p9 = scmp.lt.s32.totalorder %s3260_s28, %s3260_s28 }
  0x50   :  { %p3267_p10 = por %p3266_p9, %p3265_p8 }
  0x52   :  { %p3268_p11 = pnand %p3267_p10, %p3261_p7 }
  0x54   :  { %3271 = shalt.err (!%p3268_p11)
}
  0x55   :  { %81 = dma.hbm_to_vmem [thread:$0]  %s3509_s7, 1024, %s76_s21, [#allocation9], %s3306_s1, %s3306_s1, %s3307_s10  }
  0x56   :  { %3294 = dma.done.wait [#allocation3], 384  }
  0x57   :  { %3295 = vsyncadd [#allocation3], 4294966912 }
  0x58   :  { %3296 = dma.done.wait [#allocation6], 32768  }
  0x59   :  { %3297 = vsyncadd [#allocation6], 4294934528 }
  0x5a   :  { %3298 = dma.done.wait [#allocation9], 3072  }
  0x5b   :  { %3299 = vsyncadd [#allocation9], 4294964224  ;;  %v2740_v0 = vld [vmem:[#allocation5 + $0x4] ss:$16 sps:$4 sm:$0xff]   ;;  %v2742_v1 = vld [vmem:[#allocation5 + $0xc] ss:$16 sps:$4 sm:$0xff]  }
  0x5c   :  { %1298 = vmatprep.subr.bf16.mxu0 %v2740_v0  ;;  %v2744_v2 = vld [vmem:[#allocation5] ss:$16 sps:$4 sm:$0xff]   ;;  %v2745_v3 = vld [vmem:[#allocation5 + $0x8] ss:$16 sps:$4 sm:$0xff]   ;;  %1421 = vmatprep.subr.bf16.mxu1 %v2742_v1  ;;  %v2746_v4 = vld [vmem:[#allocation5 + $0x24] ss:$16 sps:$4 sm:$0xff]  }
  0x5d   :  { %1299 = vmatpush1.bf16.msra.mxu0 %v2744_v2  ;;  %1422 = vmatpush1.bf16.msra.mxu1 %v2745_v3  ;;  %v2748_v5 = vld [vmem:[#allocation5 + $0x2c] ss:$16 sps:$4 sm:$0xff]   ;;  %v2750_v6 = vld [vmem:[#allocation5 + $0x20] ss:$16 sps:$4 sm:$0xff]   ;;  %v2751_v7 = vld [vmem:[#allocation5 + $0x28] ss:$16 sps:$4 sm:$0xff]  }
  0x5e   :  { %1300 = vmatprep.subr.bf16.mxu0 %v2746_v4  ;;  %1423 = vmatprep.subr.bf16.mxu1 %v2748_v5  ;;  %v2752_v8 = vld [vmem:[#allocation5 + $0x44] ss:$16 sps:$4 sm:$0xff]   ;;  %v2754_v9 = vld [vmem:[#allocation5 + $0x4c] ss:$16 sps:$4 sm:$0xff]   ;;  %v2756_v10 = vld [vmem:[#allocation5 + $0x40] ss:$16 sps:$4 sm:$0xff]  }
  0x5f   :  { %v2757_v11 = vld [vmem:[#allocation5 + $0x48] ss:$16 sps:$4 sm:$0xff]   ;;  %v2758_v12 = vld [vmem:[#allocation5 + $0x64] ss:$16 sps:$4 sm:$0xff]   ;;  %v2760_v13 = vld [vmem:[#allocation5 + $0x6c] ss:$16 sps:$4 sm:$0xff]  }
  0x60   :  { %v2762_v14 = vld [vmem:[#allocation5 + $0x60] ss:$16 sps:$4 sm:$0xff]   ;;  %v2763_v15 = vld [vmem:[#allocation5 + $0x68] ss:$16 sps:$4 sm:$0xff]   ;;  %v2764_v16 = vld [vmem:[#allocation5 + $0x84] ss:$16 sps:$4 sm:$0xff]  }
  0x61   :  { %1301 = vmatpush1.bf16.msra.mxu0 %v2750_v6  ;;  %1424 = vmatpush1.bf16.msra.mxu1 %v2751_v7  ;;  %v2766_v17 = vld [vmem:[#allocation5 + $0x8c] ss:$16 sps:$4 sm:$0xff]   ;;  %v2768_v18 = vld [vmem:[#allocation5 + $0x80] ss:$16 sps:$4 sm:$0xff]   ;;  %v2769_v19 = vld [vmem:[#allocation5 + $0x88] ss:$16 sps:$4 sm:$0xff]  }
  0x62   :  { %1302 = vmatprep.subr.bf16.mxu0 %v2752_v8  ;;  %1425 = vmatprep.subr.bf16.mxu1 %v2754_v9  ;;  %v2770_v20 = vld [vmem:[#allocation5 + $0xa4] ss:$16 sps:$4 sm:$0xff]   ;;  %v2772_v21 = vld [vmem:[#allocation5 + $0xac] ss:$16 sps:$4 sm:$0xff]   ;;  %v2774_v22 = vld [vmem:[#allocation5 + $0xa0] ss:$16 sps:$4 sm:$0xff]  }
  0x63   :  { %v2775_v23 = vld [vmem:[#allocation5 + $0xa8] ss:$16 sps:$4 sm:$0xff]   ;;  %v2776_v24 = vld [vmem:[#allocation5 + $0xc4] ss:$16 sps:$4 sm:$0xff]   ;;  %v2778_v25 = vld [vmem:[#allocation5 + $0xcc] ss:$16 sps:$4 sm:$0xff]  }
  0x64   :  { %v2780_v26 = vld [vmem:[#allocation5 + $0xc0] ss:$16 sps:$4 sm:$0xff]   ;;  %v2781_v27 = vld [vmem:[#allocation5 + $0xc8] ss:$16 sps:$4 sm:$0xff]   ;;  %v2782_v28 = vld [vmem:[#allocation5 + $0xe4] ss:$16 sps:$4 sm:$0xff]  }
  0x65   :  { %1303 = vmatpush1.bf16.msra.mxu0 %v2756_v10  ;;  %1426 = vmatpush1.bf16.msra.mxu1 %v2757_v11  ;;  %v2784_v29 = vld [vmem:[#allocation5 + $0xec] ss:$16 sps:$4 sm:$0xff]   ;;  %v2786_v30 = vld [vmem:[#allocation5 + $0xe0] ss:$16 sps:$4 sm:$0xff]   ;;  %v2787_v31 = vld [vmem:[#allocation5 + $0xe8] ss:$16 sps:$4 sm:$0xff]  }
  0x66   :  { %1304 = vmatprep.subr.bf16.mxu0 %v2758_v12  ;;  %1427 = vmatprep.subr.bf16.mxu1 %v2760_v13  ;;  %v2788_v32 = vld [vmem:[#allocation5 + $0x104] ss:$16 sps:$4 sm:$0xff]   ;;  %v2790_v33 = vld [vmem:[#allocation5 + $0x10c] ss:$16 sps:$4 sm:$0xff]   ;;  %v2792_v34 = vld [vmem:[#allocation5 + $0x100] ss:$16 sps:$4 sm:$0xff]  }
  0x67   :  { %v2793_v35 = vld [vmem:[#allocation5 + $0x108] ss:$16 sps:$4 sm:$0xff]   ;;  %v2794_v36 = vld [vmem:[#allocation5 + $0x124] ss:$16 sps:$4 sm:$0xff]   ;;  %v2796_v37 = vld [vmem:[#allocation5 + $0x12c] ss:$16 sps:$4 sm:$0xff]  }
  0x68   :  { %v2798_v38 = vld [vmem:[#allocation5 + $0x120] ss:$16 sps:$4 sm:$0xff]   ;;  %v2799_v39 = vld [vmem:[#allocation5 + $0x128] ss:$16 sps:$4 sm:$0xff]   ;;  %v2800_v40 = vld [vmem:[#allocation5 + $0x144] ss:$16 sps:$4 sm:$0xff]  }
  0x69   :  { %1305 = vmatpush1.bf16.msra.mxu0 %v2762_v14  ;;  %1428 = vmatpush1.bf16.msra.mxu1 %v2763_v15  ;;  %v2802_v41 = vld [vmem:[#allocation5 + $0x14c] ss:$16 sps:$4 sm:$0xff]   ;;  %v2804_v42 = vld [vmem:[#allocation5 + $0x140] ss:$16 sps:$4 sm:$0xff]   ;;  %v2805_v43 = vld [vmem:[#allocation5 + $0x148] ss:$16 sps:$4 sm:$0xff]  }
  0x6a   :  { %1306 = vmatprep.subr.bf16.mxu0 %v2764_v16  ;;  %1429 = vmatprep.subr.bf16.mxu1 %v2766_v17  ;;  %v2806_v44 = vld [vmem:[#allocation5 + $0x164] ss:$16 sps:$4 sm:$0xff]   ;;  %v2808_v45 = vld [vmem:[#allocation5 + $0x16c] ss:$16 sps:$4 sm:$0xff]   ;;  %v2810_v47 = vld [vmem:[#allocation5 + $0x160] ss:$16 sps:$4 sm:$0xff]  }
  0x6b   :  { %v100_v46 = vld [vmem:[#allocation2] sm:$0xff]  ;;  %v2812_v50 = vld [vmem:[#allocation5 + $0x184] ss:$16 sps:$4 sm:$0xff]   ;;  %v2816_v52 = vld [vmem:[#allocation5 + $0x180] ss:$16 sps:$4 sm:$0xff]   ;;  %vm3314_vm0 = vmmov 0  }
  0x6c   :  { %v2362_v48 = vcombine.high %v100_v46, %v100_v46  ;;  %v2811_v49 = vld [vmem:[#allocation5 + $0x168] ss:$16 sps:$4 sm:$0xff]   ;;  %v2814_v51 = vld [vmem:[#allocation5 + $0x18c] ss:$16 sps:$4 sm:$0xff]   ;;  %v2818_v54 = vld [vmem:[#allocation5 + $0x1a4] ss:$16 sps:$4 sm:$0xff]   ;;  %v2361_v4 = vcombine.low %v100_v46, %v100_v46 }
  0x6d   :  { %1307 = vmatpush1.bf16.msra.mxu0 %v2768_v18  ;;  %1430 = vmatpush1.bf16.msra.mxu1 %v2769_v19  ;;  %v2817_v53 = vld [vmem:[#allocation5 + $0x188] ss:$16 sps:$4 sm:$0xff]   ;;  %v2820_v55 = vld [vmem:[#allocation5 + $0x1ac] ss:$16 sps:$4 sm:$0xff]   ;;  %v2822_v56 = vld [vmem:[#allocation5 + $0x1a0] ss:$16 sps:$4 sm:$0xff]  }
  0x6e   :  { %1308 = vmatprep.subr.bf16.mxu0 %v2770_v20  ;;  %1431 = vmatprep.subr.bf16.mxu1 %v2772_v21  ;;  %v2823_v57 = vld [vmem:[#allocation5 + $0x1a8] ss:$16 sps:$4 sm:$0xff]   ;;  %v2824_v58 = vld [vmem:[#allocation5 + $0x1c4] ss:$16 sps:$4 sm:$0xff]   ;;  %v2826_v59 = vld [vmem:[#allocation5 + $0x1cc] ss:$16 sps:$4 sm:$0xff]  }
  0x6f   :  { %1330 = vmatprep.mubr.bf16.mxu0 %v2362_v48  ;;  %1453 = vmatprep.mubr.bf16.mxu1 %v2362_v48  ;;  %v2828_v60 = vld [vmem:[#allocation5 + $0x1c0] ss:$16 sps:$4 sm:$0xff]   ;;  %v2829_v61 = vld [vmem:[#allocation5 + $0x1c8] ss:$16 sps:$4 sm:$0xff]   ;;  %v2830_v62 = vld [vmem:[#allocation5 + $0x1e4] ss:$16 sps:$4 sm:$0xff]  }
  0x70   :  { %v2832_v63 = vld [vmem:[#allocation5 + $0x1ec] ss:$16 sps:$4 sm:$0xff]   ;;  %v2834_v0 = vld [vmem:[#allocation5 + $0x1e0] ss:$16 sps:$4 sm:$0xff]   ;;  %v2835_v1 = vld [vmem:[#allocation5 + $0x1e8] ss:$16 sps:$4 sm:$0xff]  }
  0x71   :  { %1309 = vmatpush1.bf16.msra.mxu0 %v2774_v22  ;;  %1432 = vmatpush1.bf16.msra.mxu1 %v2775_v23  ;;  %v2840_v2 = vld [vmem:[#allocation5 + $0x204] ss:$16 sps:$4 sm:$0xff]   ;;  %v2843_v3 = vld [vmem:[#allocation5 + $0x20c] ss:$16 sps:$4 sm:$0xff]   ;;  %v2838_v5 = vld [vmem:[#allocation5 + $0x200] ss:$16 sps:$4 sm:$0xff]  }
  0x72   :  { %1310 = vmatprep.subr.bf16.mxu0 %v2776_v24  ;;  %1433 = vmatprep.subr.bf16.mxu1 %v2778_v25  ;;  %v2841_v6 = vld [vmem:[#allocation5 + $0x208] ss:$16 sps:$4 sm:$0xff]   ;;  %v2846_v7 = vld [vmem:[#allocation5 + $0x224] ss:$16 sps:$4 sm:$0xff]   ;;  %v2849_v8 = vld [vmem:[#allocation5 + $0x22c] ss:$16 sps:$4 sm:$0xff]  }
  0x73   :  { %v2844_v9 = vld [vmem:[#allocation5 + $0x220] ss:$16 sps:$4 sm:$0xff]   ;;  %v2847_v10 = vld [vmem:[#allocation5 + $0x228] ss:$16 sps:$4 sm:$0xff]   ;;  %v2852_v11 = vld [vmem:[#allocation5 + $0x244] ss:$16 sps:$4 sm:$0xff]  }
  0x74   :  { %v2855_v12 = vld [vmem:[#allocation5 + $0x24c] ss:$16 sps:$4 sm:$0xff]   ;;  %v2850_v13 = vld [vmem:[#allocation5 + $0x240] ss:$16 sps:$4 sm:$0xff]   ;;  %v2853_v14 = vld [vmem:[#allocation5 + $0x248] ss:$16 sps:$4 sm:$0xff]  }
  0x75   :  { %1311 = vmatpush1.bf16.msra.mxu0 %v2780_v26  ;;  %1434 = vmatpush1.bf16.msra.mxu1 %v2781_v27  ;;  %v2858_v15 = vld [vmem:[#allocation5 + $0x264] ss:$16 sps:$4 sm:$0xff]   ;;  %v2861_v16 = vld [vmem:[#allocation5 + $0x26c] ss:$16 sps:$4 sm:$0xff]   ;;  %v2856_v17 = vld [vmem:[#allocation5 + $0x260] ss:$16 sps:$4 sm:$0xff]  }
  0x76   :  { %1312 = vmatprep.subr.bf16.mxu0 %v2782_v28  ;;  %1435 = vmatprep.subr.bf16.mxu1 %v2784_v29  ;;  %v2859_v18 = vld [vmem:[#allocation5 + $0x268] ss:$16 sps:$4 sm:$0xff]   ;;  %v2864_v19 = vld [vmem:[#allocation5 + $0x284] ss:$16 sps:$4 sm:$0xff]   ;;  %v2867_v20 = vld [vmem:[#allocation5 + $0x28c] ss:$16 sps:$4 sm:$0xff]  }
  0x77   :  { %v2862_v21 = vld [vmem:[#allocation5 + $0x280] ss:$16 sps:$4 sm:$0xff]   ;;  %v2865_v22 = vld [vmem:[#allocation5 + $0x288] ss:$16 sps:$4 sm:$0xff]   ;;  %v2870_v23 = vld [vmem:[#allocation5 + $0x2a4] ss:$16 sps:$4 sm:$0xff]  }
  0x78   :  { %v2873_v24 = vld [vmem:[#allocation5 + $0x2ac] ss:$16 sps:$4 sm:$0xff]   ;;  %v2868_v25 = vld [vmem:[#allocation5 + $0x2a0] ss:$16 sps:$4 sm:$0xff]   ;;  %v2871_v26 = vld [vmem:[#allocation5 + $0x2a8] ss:$16 sps:$4 sm:$0xff]  }
  0x79   :  { %1313 = vmatpush1.bf16.msra.mxu0 %v2786_v30  ;;  %1436 = vmatpush1.bf16.msra.mxu1 %v2787_v31  ;;  %v2876_v27 = vld [vmem:[#allocation5 + $0x2c4] ss:$16 sps:$4 sm:$0xff]   ;;  %v2879_v28 = vld [vmem:[#allocation5 + $0x2cc] ss:$16 sps:$4 sm:$0xff]   ;;  %v2874_v31 = vld [vmem:[#allocation5 + $0x2c0] ss:$16 sps:$4 sm:$0xff]  }
  0x7a   :  { %1314 = vmatprep.subr.bf16.mxu0 %v2788_v32  ;;  %1437 = vmatprep.subr.bf16.mxu1 %v2790_v33  ;;  %v3439_v29 = vld [vmem:[#allocation2 + $0x8] sm:$0xff]  ;;  %v2877_v32 = vld [vmem:[#allocation5 + $0x2c8] ss:$16 sps:$4 sm:$0xff]   ;;  %v2903_v46 = vld [vmem:[#allocation5 + $0x34c] ss:$16 sps:$4 sm:$0xff]  }
  0x7b   :  { %v2364_v30 = vcombine.high %v3439_v29, %v3439_v29  ;;  %v2882_v33 = vld [vmem:[#allocation5 + $0x2e4] ss:$16 sps:$4 sm:$0xff]   ;;  %v2901_v48 = vld [vmem:[#allocation5 + $0x348] ss:$16 sps:$4 sm:$0xff]  }
  0x7d   :  { %1315 = vmatpush1.bf16.msra.mxu0 %v2792_v34  ;;  %1438 = vmatpush1.bf16.msra.mxu1 %v2793_v35  ;;  %v2885_v34 = vld [vmem:[#allocation5 + $0x2ec] ss:$16 sps:$4 sm:$0xff]   ;;  %v2880_v35 = vld [vmem:[#allocation5 + $0x2e0] ss:$16 sps:$4 sm:$0xff]  }
  0x7e   :  { %1316 = vmatprep.subr.bf16.mxu0 %v2794_v36  ;;  %1439 = vmatprep.subr.bf16.mxu1 %v2796_v37  ;;  %v2883_v36 = vld [vmem:[#allocation5 + $0x2e8] ss:$16 sps:$4 sm:$0xff]   ;;  %v2888_v37 = vld [vmem:[#allocation5 + $0x304] ss:$16 sps:$4 sm:$0xff]  }
  0x81   :  { %1317 = vmatpush1.bf16.msra.mxu0 %v2798_v38  ;;  %1440 = vmatpush1.bf16.msra.mxu1 %v2799_v39  ;;  %v2891_v38 = vld [vmem:[#allocation5 + $0x30c] ss:$16 sps:$4 sm:$0xff]   ;;  %v2886_v39 = vld [vmem:[#allocation5 + $0x300] ss:$16 sps:$4 sm:$0xff]  }
  0x82   :  { %1318 = vmatprep.subr.bf16.mxu0 %v2800_v40  ;;  %1441 = vmatprep.subr.bf16.mxu1 %v2802_v41  ;;  %v2889_v40 = vld [vmem:[#allocation5 + $0x308] ss:$16 sps:$4 sm:$0xff]   ;;  %v2894_v41 = vld [vmem:[#allocation5 + $0x324] ss:$16 sps:$4 sm:$0xff]  }
  0x85   :  { %1319 = vmatpush1.bf16.msra.mxu0 %v2804_v42  ;;  %1442 = vmatpush1.bf16.msra.mxu1 %v2805_v43  ;;  %v2897_v42 = vld [vmem:[#allocation5 + $0x32c] ss:$16 sps:$4 sm:$0xff]   ;;  %v2892_v43 = vld [vmem:[#allocation5 + $0x320] ss:$16 sps:$4 sm:$0xff]  }
  0x86   :  { %1320 = vmatprep.subr.bf16.mxu0 %v2806_v44  ;;  %1443 = vmatprep.subr.bf16.mxu1 %v2808_v45  ;;  %v2895_v44 = vld [vmem:[#allocation5 + $0x328] ss:$16 sps:$4 sm:$0xff]   ;;  %v2900_v45 = vld [vmem:[#allocation5 + $0x344] ss:$16 sps:$4 sm:$0xff]  }
  0x89   :  { %1321 = vmatpush1.bf16.msra.mxu0 %v2810_v47  ;;  %1444 = vmatpush1.bf16.msra.mxu1 %v2811_v49  ;;  %v2898_v47 = vld [vmem:[#allocation5 + $0x340] ss:$16 sps:$4 sm:$0xff]   ;;  %v2906_v49 = vld [vmem:[#allocation5 + $0x364] ss:$16 sps:$4 sm:$0xff]  }
  0x8a   :  { %1322 = vmatprep.subr.bf16.mxu0 %v2812_v50  ;;  %1445 = vmatprep.subr.bf16.mxu1 %v2814_v51  ;;  %v2909_v50 = vld [vmem:[#allocation5 + $0x36c] ss:$16 sps:$4 sm:$0xff]   ;;  %v2904_v51 = vld [vmem:[#allocation5 + $0x360] ss:$16 sps:$4 sm:$0xff]  }
  0x8d   :  { %1323 = vmatpush1.bf16.msra.mxu0 %v2816_v52  ;;  %1446 = vmatpush1.bf16.msra.mxu1 %v2817_v53  ;;  %v2907_v52 = vld [vmem:[#allocation5 + $0x368] ss:$16 sps:$4 sm:$0xff]   ;;  %v2912_v53 = vld [vmem:[#allocation5 + $0x384] ss:$16 sps:$4 sm:$0xff]  }
  0x8e   :  { %1324 = vmatprep.subr.bf16.mxu0 %v2818_v54  ;;  %1447 = vmatprep.subr.bf16.mxu1 %v2820_v55  ;;  %v2915_v54 = vld [vmem:[#allocation5 + $0x38c] ss:$16 sps:$4 sm:$0xff]   ;;  %v2910_v55 = vld [vmem:[#allocation5 + $0x380] ss:$16 sps:$4 sm:$0xff]  }
  0x91   :  { %1325 = vmatpush1.bf16.msra.mxu0 %v2822_v56  ;;  %1448 = vmatpush1.bf16.msra.mxu1 %v2823_v57  ;;  %v2913_v56 = vld [vmem:[#allocation5 + $0x388] ss:$16 sps:$4 sm:$0xff]   ;;  %v2918_v57 = vld [vmem:[#allocation5 + $0x3a4] ss:$16 sps:$4 sm:$0xff]  }
  0x92   :  { %1326 = vmatprep.subr.bf16.mxu0 %v2824_v58  ;;  %1449 = vmatprep.subr.bf16.mxu1 %v2826_v59  ;;  %v2921_v58 = vld [vmem:[#allocation5 + $0x3ac] ss:$16 sps:$4 sm:$0xff]   ;;  %v2916_v59 = vld [vmem:[#allocation5 + $0x3a0] ss:$16 sps:$4 sm:$0xff]  }
  0x95   :  { %1327 = vmatpush1.bf16.msra.mxu0 %v2828_v60  ;;  %1450 = vmatpush1.bf16.msra.mxu1 %v2829_v61  ;;  %v2919_v60 = vld [vmem:[#allocation5 + $0x3a8] ss:$16 sps:$4 sm:$0xff]   ;;  %v2924_v61 = vld [vmem:[#allocation5 + $0x3c4] ss:$16 sps:$4 sm:$0xff]  }
  0x96   :  { %1328 = vmatprep.subr.bf16.mxu0 %v2830_v62  ;;  %1451 = vmatprep.subr.bf16.mxu1 %v2832_v63  ;;  %v2927_v62 = vld [vmem:[#allocation5 + $0x3cc] ss:$16 sps:$4 sm:$0xff]   ;;  %v2922_v63 = vld [vmem:[#allocation5 + $0x3c0] ss:$16 sps:$4 sm:$0xff]  }
  0x99   :  { %1329 = vmatpush1.bf16.msra.mxu0 %v2834_v0  ;;  %1452 = vmatpush1.bf16.msra.mxu1 %v2835_v1  ;;  %v2925_v0 = vld [vmem:[#allocation5 + $0x3c8] ss:$16 sps:$4 sm:$0xff]   ;;  %v2930_v1 = vld [vmem:[#allocation5 + $0x3e4] ss:$16 sps:$4 sm:$0xff]  }
  0x9a   :  { %1339 = vmatprep.subr.bf16.mxu0 %v2840_v2  ;;  %1462 = vmatprep.subr.bf16.mxu1 %v2843_v3  ;;  %v2933_v2 = vld [vmem:[#allocation5 + $0x3ec] ss:$16 sps:$4 sm:$0xff]   ;;  %v2928_v3 = vld [vmem:[#allocation5 + $0x3e0] ss:$16 sps:$4 sm:$0xff]  }
  0x9c   :  { %1331 = vmatmul.mubr.bf16.vlgmr.msra.gmra.mrb[0].mxu0 %v2361_v4  ;;  %1454 = vmatmul.mubr.bf16.vlgmr.msra.gmra.mrb[0].mxu1 %v2361_v4  ;;  %v2931_v4 = vld [vmem:[#allocation5 + $0x3e8] ss:$16 sps:$4 sm:$0xff]  }
  0x9d   :  { %1340 = vmatpush1.bf16.msra.mxu0 %v2838_v5  ;;  %1463 = vmatpush1.bf16.msra.mxu1 %v2841_v6  ;;  %v2938_v5 = vld [vmem:[#allocation5 + $0x404] ss:$16 sps:$4 sm:$0xff]   ;;  %v2941_v6 = vld [vmem:[#allocation5 + $0x40c] ss:$16 sps:$4 sm:$0xff]  }
  0x9e   :  { %1341 = vmatprep.subr.bf16.mxu0 %v2846_v7  ;;  %1464 = vmatprep.subr.bf16.mxu1 %v2849_v8  ;;  %v2363_v7 = vcombine.low %v3439_v29, %v3439_v29  ;;  %v2936_v8 = vld [vmem:[#allocation5 + $0x400] ss:$16 sps:$4 sm:$0xff]   ;;  %v2971_v29 = vld [vmem:[#allocation5 + $0x4ac] ss:$16 sps:$4 sm:$0xff]  }
  0x9f   :  { %1371 = vmatprep.mubr.bf16.mxu0 %v2364_v30  ;;  %1494 = vmatprep.mubr.bf16.mxu1 %v2364_v30  ;;  %v2966_v30 = vld [vmem:[#allocation5 + $0x4a0] ss:$16 sps:$4 sm:$0xff]  }
  0xa1   :  { %1342 = vmatpush1.bf16.msra.mxu0 %v2844_v9  ;;  %1465 = vmatpush1.bf16.msra.mxu1 %v2847_v10  ;;  %v2939_v9 = vld [vmem:[#allocation5 + $0x408] ss:$16 sps:$4 sm:$0xff]   ;;  %v2944_v10 = vld [vmem:[#allocation5 + $0x424] ss:$16 sps:$4 sm:$0xff]  }
  0xa2   :  { %1343 = vmatprep.subr.bf16.mxu0 %v2852_v11  ;;  %1466 = vmatprep.subr.bf16.mxu1 %v2855_v12  ;;  %v3445_v11 = vld [vmem:[#allocation2 + $0x10] sm:$0xff] }
  0xa3   :  { %v2947_v12 = vld [vmem:[#allocation5 + $0x42c] ss:$16 sps:$4 sm:$0xff]  }
  0xa5   :  { %1344 = vmatpush1.bf16.msra.mxu0 %v2850_v13  ;;  %1467 = vmatpush1.bf16.msra.mxu1 %v2853_v14  ;;  %v2366_v13 = vcombine.high %v3445_v11, %v3445_v11  ;;  %v2942_v14 = vld [vmem:[#allocation5 + $0x420] ss:$16 sps:$4 sm:$0xff]  }
  0xa6   :  { %1345 = vmatprep.subr.bf16.mxu0 %v2858_v15  ;;  %1468 = vmatprep.subr.bf16.mxu1 %v2861_v16  ;;  %v2945_v15 = vld [vmem:[#allocation5 + $0x428] ss:$16 sps:$4 sm:$0xff]   ;;  %v2950_v16 = vld [vmem:[#allocation5 + $0x444] ss:$16 sps:$4 sm:$0xff]  }
  0xa9   :  { %1346 = vmatpush1.bf16.msra.mxu0 %v2856_v17  ;;  %1469 = vmatpush1.bf16.msra.mxu1 %v2859_v18  ;;  %v2953_v17 = vld [vmem:[#allocation5 + $0x44c] ss:$16 sps:$4 sm:$0xff]   ;;  %v2948_v18 = vld [vmem:[#allocation5 + $0x440] ss:$16 sps:$4 sm:$0xff]  }
  0xaa   :  { %1347 = vmatprep.subr.bf16.mxu0 %v2864_v19  ;;  %1470 = vmatprep.subr.bf16.mxu1 %v2867_v20  ;;  %v2951_v19 = vld [vmem:[#allocation5 + $0x448] ss:$16 sps:$4 sm:$0xff]   ;;  %v2956_v20 = vld [vmem:[#allocation5 + $0x464] ss:$16 sps:$4 sm:$0xff]  }
  0xad   :  { %1348 = vmatpush1.bf16.msra.mxu0 %v2862_v21  ;;  %1471 = vmatpush1.bf16.msra.mxu1 %v2865_v22  ;;  %v2959_v21 = vld [vmem:[#allocation5 + $0x46c] ss:$16 sps:$4 sm:$0xff]   ;;  %v2954_v22 = vld [vmem:[#allocation5 + $0x460] ss:$16 sps:$4 sm:$0xff]  }
  0xae   :  { %1349 = vmatprep.subr.bf16.mxu0 %v2870_v23  ;;  %1472 = vmatprep.subr.bf16.mxu1 %v2873_v24  ;;  %v2957_v23 = vld [vmem:[#allocation5 + $0x468] ss:$16 sps:$4 sm:$0xff]   ;;  %v2962_v24 = vld [vmem:[#allocation5 + $0x484] ss:$16 sps:$4 sm:$0xff]  }
  0xb1   :  { %1350 = vmatpush1.bf16.msra.mxu0 %v2868_v25  ;;  %1473 = vmatpush1.bf16.msra.mxu1 %v2871_v26  ;;  %v2965_v25 = vld [vmem:[#allocation5 + $0x48c] ss:$16 sps:$4 sm:$0xff]   ;;  %v2960_v26 = vld [vmem:[#allocation5 + $0x480] ss:$16 sps:$4 sm:$0xff]  }
  0xb2   :  { %1351 = vmatprep.subr.bf16.mxu0 %v2876_v27  ;;  %1474 = vmatprep.subr.bf16.mxu1 %v2879_v28  ;;  %v2963_v27 = vld [vmem:[#allocation5 + $0x488] ss:$16 sps:$4 sm:$0xff]   ;;  %v2968_v28 = vld [vmem:[#allocation5 + $0x4a4] ss:$16 sps:$4 sm:$0xff]  }
  0xb5   :  { %1352 = vmatpush1.bf16.msra.mxu0 %v2874_v31  ;;  %1475 = vmatpush1.bf16.msra.mxu1 %v2877_v32  ;;  %v2969_v31 = vld [vmem:[#allocation5 + $0x4a8] ss:$16 sps:$4 sm:$0xff]   ;;  %v2974_v32 = vld [vmem:[#allocation5 + $0x4c4] ss:$16 sps:$4 sm:$0xff]  }
  0xb6   :  { %1353 = vmatprep.subr.bf16.mxu0 %v2882_v33  ;;  %1476 = vmatprep.subr.bf16.mxu1 %v2885_v34  ;;  %v2977_v33 = vld [vmem:[#allocation5 + $0x4cc] ss:$16 sps:$4 sm:$0xff]   ;;  %v2972_v34 = vld [vmem:[#allocation5 + $0x4c0] ss:$16 sps:$4 sm:$0xff]  }
  0xb9   :  { %1354 = vmatpush1.bf16.msra.mxu0 %v2880_v35  ;;  %1477 = vmatpush1.bf16.msra.mxu1 %v2883_v36  ;;  %v2975_v35 = vld [vmem:[#allocation5 + $0x4c8] ss:$16 sps:$4 sm:$0xff]   ;;  %v2980_v36 = vld [vmem:[#allocation5 + $0x4e4] ss:$16 sps:$4 sm:$0xff]  }
  0xba   :  { %1355 = vmatprep.subr.bf16.mxu0 %v2888_v37  ;;  %1478 = vmatprep.subr.bf16.mxu1 %v2891_v38  ;;  %v2983_v37 = vld [vmem:[#allocation5 + $0x4ec] ss:$16 sps:$4 sm:$0xff]   ;;  %v2978_v38 = vld [vmem:[#allocation5 + $0x4e0] ss:$16 sps:$4 sm:$0xff]  }
  0xbd   :  { %1356 = vmatpush1.bf16.msra.mxu0 %v2886_v39  ;;  %1479 = vmatpush1.bf16.msra.mxu1 %v2889_v40  ;;  %v2981_v39 = vld [vmem:[#allocation5 + $0x4e8] ss:$16 sps:$4 sm:$0xff]   ;;  %v2986_v40 = vld [vmem:[#allocation5 + $0x504] ss:$16 sps:$4 sm:$0xff]  }
  0xbe   :  { %1357 = vmatprep.subr.bf16.mxu0 %v2894_v41  ;;  %1480 = vmatprep.subr.bf16.mxu1 %v2897_v42  ;;  %v2989_v41 = vld [vmem:[#allocation5 + $0x50c] ss:$16 sps:$4 sm:$0xff]   ;;  %v2984_v42 = vld [vmem:[#allocation5 + $0x500] ss:$16 sps:$4 sm:$0xff]  }
  0xc1   :  { %1358 = vmatpush1.bf16.msra.mxu0 %v2892_v43  ;;  %1481 = vmatpush1.bf16.msra.mxu1 %v2895_v44  ;;  %v2987_v43 = vld [vmem:[#allocation5 + $0x508] ss:$16 sps:$4 sm:$0xff]   ;;  %v2992_v44 = vld [vmem:[#allocation5 + $0x524] ss:$16 sps:$4 sm:$0xff]  }
  0xc2   :  { %1359 = vmatprep.subr.bf16.mxu0 %v2900_v45  ;;  %1482 = vmatprep.subr.bf16.mxu1 %v2903_v46  ;;  %v2995_v45 = vld [vmem:[#allocation5 + $0x52c] ss:$16 sps:$4 sm:$0xff]   ;;  %v2990_v46 = vld [vmem:[#allocation5 + $0x520] ss:$16 sps:$4 sm:$0xff]  }
  0xc5   :  { %1360 = vmatpush1.bf16.msra.mxu0 %v2898_v47  ;;  %1483 = vmatpush1.bf16.msra.mxu1 %v2901_v48  ;;  %v2993_v47 = vld [vmem:[#allocation5 + $0x528] ss:$16 sps:$4 sm:$0xff]   ;;  %v2998_v48 = vld [vmem:[#allocation5 + $0x544] ss:$16 sps:$4 sm:$0xff]  }
  0xc6   :  { %1361 = vmatprep.subr.bf16.mxu0 %v2906_v49  ;;  %1484 = vmatprep.subr.bf16.mxu1 %v2909_v50  ;;  %v3001_v49 = vld [vmem:[#allocation5 + $0x54c] ss:$16 sps:$4 sm:$0xff]   ;;  %v2996_v50 = vld [vmem:[#allocation5 + $0x540] ss:$16 sps:$4 sm:$0xff]  }
  0xc9   :  { %1362 = vmatpush1.bf16.msra.mxu0 %v2904_v51  ;;  %1485 = vmatpush1.bf16.msra.mxu1 %v2907_v52  ;;  %v2999_v51 = vld [vmem:[#allocation5 + $0x548] ss:$16 sps:$4 sm:$0xff]   ;;  %v3004_v52 = vld [vmem:[#allocation5 + $0x564] ss:$16 sps:$4 sm:$0xff]  }
  0xca   :  { %1363 = vmatprep.subr.bf16.mxu0 %v2912_v53  ;;  %1486 = vmatprep.subr.bf16.mxu1 %v2915_v54  ;;  %v3007_v53 = vld [vmem:[#allocation5 + $0x56c] ss:$16 sps:$4 sm:$0xff]   ;;  %v3002_v54 = vld [vmem:[#allocation5 + $0x560] ss:$16 sps:$4 sm:$0xff]  }
  0xcd   :  { %1364 = vmatpush1.bf16.msra.mxu0 %v2910_v55  ;;  %1487 = vmatpush1.bf16.msra.mxu1 %v2913_v56  ;;  %v3005_v55 = vld [vmem:[#allocation5 + $0x568] ss:$16 sps:$4 sm:$0xff]   ;;  %v3010_v56 = vld [vmem:[#allocation5 + $0x584] ss:$16 sps:$4 sm:$0xff]  }
  0xce   :  { %1365 = vmatprep.subr.bf16.mxu0 %v2918_v57  ;;  %1488 = vmatprep.subr.bf16.mxu1 %v2921_v58  ;;  %v3013_v57 = vld [vmem:[#allocation5 + $0x58c] ss:$16 sps:$4 sm:$0xff]   ;;  %v3008_v58 = vld [vmem:[#allocation5 + $0x580] ss:$16 sps:$4 sm:$0xff]  }
  0xd1   :  { %1366 = vmatpush1.bf16.msra.mxu0 %v2916_v59  ;;  %1489 = vmatpush1.bf16.msra.mxu1 %v2919_v60  ;;  %v3011_v59 = vld [vmem:[#allocation5 + $0x588] ss:$16 sps:$4 sm:$0xff]   ;;  %v3016_v60 = vld [vmem:[#allocation5 + $0x5a4] ss:$16 sps:$4 sm:$0xff]  }
  0xd2   :  { %1367 = vmatprep.subr.bf16.mxu0 %v2924_v61  ;;  %1490 = vmatprep.subr.bf16.mxu1 %v2927_v62  ;;  %v3019_v61 = vld [vmem:[#allocation5 + $0x5ac] ss:$16 sps:$4 sm:$0xff]   ;;  %v3014_v62 = vld [vmem:[#allocation5 + $0x5a0] ss:$16 sps:$4 sm:$0xff]  }
  0xd5   :  { %1368 = vmatpush1.bf16.msra.mxu0 %v2922_v63  ;;  %1491 = vmatpush1.bf16.msra.mxu1 %v2925_v0  ;;  %v3017_v63 = vld [vmem:[#allocation5 + $0x5a8] ss:$16 sps:$4 sm:$0xff]   ;;  %v3022_v0 = vld [vmem:[#allocation5 + $0x5c4] ss:$16 sps:$4 sm:$0xff]  }
  0xd6   :  { %1369 = vmatprep.subr.bf16.mxu0 %v2930_v1  ;;  %1492 = vmatprep.subr.bf16.mxu1 %v2933_v2  ;;  %v3025_v1 = vld [vmem:[#allocation5 + $0x5cc] ss:$16 sps:$4 sm:$0xff]   ;;  %v3020_v2 = vld [vmem:[#allocation5 + $0x5c0] ss:$16 sps:$4 sm:$0xff]  }
  0xd9   :  { %1370 = vmatpush1.bf16.msra.mxu0 %v2928_v3  ;;  %1493 = vmatpush1.bf16.msra.mxu1 %v2931_v4  ;;  %v3023_v3 = vld [vmem:[#allocation5 + $0x5c8] ss:$16 sps:$4 sm:$0xff]   ;;  %v3028_v4 = vld [vmem:[#allocation5 + $0x5e4] ss:$16 sps:$4 sm:$0xff]  }
  0xda   :  { %1380 = vmatprep.subr.bf16.mxu0 %v2938_v5  ;;  %1503 = vmatprep.subr.bf16.mxu1 %v2941_v6  ;;  %v3031_v5 = vld [vmem:[#allocation5 + $0x5ec] ss:$16 sps:$4 sm:$0xff]   ;;  %v3026_v6 = vld [vmem:[#allocation5 + $0x5e0] ss:$16 sps:$4 sm:$0xff]  }
  0xdc   :  { %1372 = vmatmul.mubr.bf16.vlgmr.msra.gmra.mrb[0].mxu0 %v2363_v7  ;;  %1495 = vmatmul.mubr.bf16.vlgmr.msra.gmra.mrb[0].mxu1 %v2363_v7  ;;  %v3029_v7 = vld [vmem:[#allocation5 + $0x5e8] ss:$16 sps:$4 sm:$0xff]  }
  0xdd   :  { %1381 = vmatpush1.bf16.msra.mxu0 %v2936_v8  ;;  %1504 = vmatpush1.bf16.msra.mxu1 %v2939_v9  ;;  %v3036_v8 = vld [vmem:[#allocation7 + $0x4] ss:$8 sps:$4 sm:$0xff]   ;;  %v2365_v9 = vcombine.low %v3445_v11, %v3445_v11  ;;  %v3046_v11 = vld [vmem:[#allocation7 + $0x40] ss:$8 sps:$4 sm:$0xff]  }
  0xde   :  { %1382 = vmatprep.subr.bf16.mxu0 %v2944_v10  ;;  %1505 = vmatprep.subr.bf16.mxu1 %v2947_v12  ;;  %v3034_v10 = vld [vmem:[#allocation7] ss:$8 sps:$4 sm:$0xff]   ;;  %v3039_v12 = vld [vmem:[#allocation7 + $0x14] ss:$8 sps:$4 sm:$0xff]  }
  0xdf   :  { %1412 = vmatprep.mubr.bf16.mxu0 %v2366_v13  ;;  %1535 = vmatprep.mubr.bf16.mxu1 %v2366_v13  ;;  %v3037_v13 = vld [vmem:[#allocation7 + $0x10] ss:$8 sps:$4 sm:$0xff]  }
  0xe1   :  { %1383 = vmatpush1.bf16.msra.mxu0 %v2942_v14  ;;  %1506 = vmatpush1.bf16.msra.mxu1 %v2945_v15  ;;  %v3042_v14 = vld [vmem:[#allocation7 + $0x24] ss:$8 sps:$4 sm:$0xff]   ;;  %v3040_v15 = vld [vmem:[#allocation7 + $0x20] ss:$8 sps:$4 sm:$0xff]  }
  0xe2   :  { %1384 = vmatprep.subr.bf16.mxu0 %v2950_v16  ;;  %1507 = vmatprep.subr.bf16.mxu1 %v2953_v17  ;;  %v3045_v16 = vld [vmem:[#allocation7 + $0x34] ss:$8 sps:$4 sm:$0xff]   ;;  %v3043_v17 = vld [vmem:[#allocation7 + $0x30] ss:$8 sps:$4 sm:$0xff]  }
  0xe5   :  { %1385 = vmatpush1.bf16.msra.mxu0 %v2948_v18  ;;  %1508 = vmatpush1.bf16.msra.mxu1 %v2951_v19  ;;  %v3048_v18 = vld [vmem:[#allocation7 + $0x44] ss:$8 sps:$4 sm:$0xff]   ;;  %v3051_v19 = vld [vmem:[#allocation7 + $0x54] ss:$8 sps:$4 sm:$0xff]  }
  0xe6   :  { %1386 = vmatprep.subr.bf16.mxu0 %v2956_v20  ;;  %1509 = vmatprep.subr.bf16.mxu1 %v2959_v21  ;;  %v3049_v20 = vld [vmem:[#allocation7 + $0x50] ss:$8 sps:$4 sm:$0xff]   ;;  %v3054_v21 = vld [vmem:[#allocation7 + $0x64] ss:$8 sps:$4 sm:$0xff]  }
  0xe9   :  { %1387 = vmatpush1.bf16.msra.mxu0 %v2954_v22  ;;  %1510 = vmatpush1.bf16.msra.mxu1 %v2957_v23  ;;  %v3052_v22 = vld [vmem:[#allocation7 + $0x60] ss:$8 sps:$4 sm:$0xff]   ;;  %v3057_v23 = vld [vmem:[#allocation7 + $0x74] ss:$8 sps:$4 sm:$0xff]  }
  0xea   :  { %1388 = vmatprep.subr.bf16.mxu0 %v2962_v24  ;;  %1511 = vmatprep.subr.bf16.mxu1 %v2965_v25  ;;  %v3055_v24 = vld [vmem:[#allocation7 + $0x70] ss:$8 sps:$4 sm:$0xff]   ;;  %v3060_v25 = vld [vmem:[#allocation7 + $0x84] ss:$8 sps:$4 sm:$0xff]  }
  0xed   :  { %1389 = vmatpush1.bf16.msra.mxu0 %v2960_v26  ;;  %1512 = vmatpush1.bf16.msra.mxu1 %v2963_v27  ;;  %v3058_v26 = vld [vmem:[#allocation7 + $0x80] ss:$8 sps:$4 sm:$0xff]   ;;  %v3063_v27 = vld [vmem:[#allocation7 + $0x94] ss:$8 sps:$4 sm:$0xff]  }
  0xee   :  { %1390 = vmatprep.subr.bf16.mxu0 %v2968_v28  ;;  %1513 = vmatprep.subr.bf16.mxu1 %v2971_v29  ;;  %v3061_v28 = vld [vmem:[#allocation7 + $0x90] ss:$8 sps:$4 sm:$0xff]   ;;  %v3066_v29 = vld [vmem:[#allocation7 + $0xa4] ss:$8 sps:$4 sm:$0xff]  }
  0xf1   :  { %1391 = vmatpush1.bf16.msra.mxu0 %v2966_v30  ;;  %1514 = vmatpush1.bf16.msra.mxu1 %v2969_v31  ;;  %v3064_v30 = vld [vmem:[#allocation7 + $0xa0] ss:$8 sps:$4 sm:$0xff]   ;;  %v3069_v31 = vld [vmem:[#allocation7 + $0xb4] ss:$8 sps:$4 sm:$0xff]  }
  0xf2   :  { %1392 = vmatprep.subr.bf16.mxu0 %v2974_v32  ;;  %1515 = vmatprep.subr.bf16.mxu1 %v2977_v33  ;;  %v3067_v32 = vld [vmem:[#allocation7 + $0xb0] ss:$8 sps:$4 sm:$0xff]   ;;  %v3072_v33 = vld [vmem:[#allocation7 + $0xc4] ss:$8 sps:$4 sm:$0xff]  }
  0xf5   :  { %1393 = vmatpush1.bf16.msra.mxu0 %v2972_v34  ;;  %1516 = vmatpush1.bf16.msra.mxu1 %v2975_v35  ;;  %v3070_v34 = vld [vmem:[#allocation7 + $0xc0] ss:$8 sps:$4 sm:$0xff]   ;;  %v3075_v35 = vld [vmem:[#allocation7 + $0xd4] ss:$8 sps:$4 sm:$0xff]  }
  0xf6   :  { %1394 = vmatprep.subr.bf16.mxu0 %v2980_v36  ;;  %1517 = vmatprep.subr.bf16.mxu1 %v2983_v37  ;;  %v3073_v36 = vld [vmem:[#allocation7 + $0xd0] ss:$8 sps:$4 sm:$0xff]   ;;  %v3078_v37 = vld [vmem:[#allocation7 + $0xe4] ss:$8 sps:$4 sm:$0xff]  }
  0xf9   :  { %1395 = vmatpush1.bf16.msra.mxu0 %v2978_v38  ;;  %1518 = vmatpush1.bf16.msra.mxu1 %v2981_v39  ;;  %v3076_v38 = vld [vmem:[#allocation7 + $0xe0] ss:$8 sps:$4 sm:$0xff]   ;;  %v3081_v39 = vld [vmem:[#allocation7 + $0xf4] ss:$8 sps:$4 sm:$0xff]  }
  0xfa   :  { %1396 = vmatprep.subr.bf16.mxu0 %v2986_v40  ;;  %1519 = vmatprep.subr.bf16.mxu1 %v2989_v41  ;;  %v3079_v40 = vld [vmem:[#allocation7 + $0xf0] ss:$8 sps:$4 sm:$0xff]   ;;  %v3084_v41 = vld [vmem:[#allocation7 + $0x104] ss:$8 sps:$4 sm:$0xff]  }
  0xfd   :  { %1397 = vmatpush1.bf16.msra.mxu0 %v2984_v42  ;;  %1520 = vmatpush1.bf16.msra.mxu1 %v2987_v43  ;;  %v3130_v42 = vld [vmem:[#allocation8 + $0x40] sm:$0xff]  }
  0xfe   :  { %1398 = vmatprep.subr.bf16.mxu0 %v2992_v44  ;;  %1521 = vmatprep.subr.bf16.mxu1 %v2995_v45  ;;  %v3131_v43 = vld [vmem:[#allocation8] sm:$0xff]   ;;  %v3132_v44 = vld [vmem:[#allocation8 + $0x48] sm:$0xff]  }
  0xff   :  { %v3133_v45 = vld [vmem:[#allocation8 + $0x8] sm:$0xff]  }
 0x101   :  { %1399 = vmatpush1.bf16.msra.mxu0 %v2990_v46  ;;  %1522 = vmatpush1.bf16.msra.mxu1 %v2993_v47  ;;  %v3134_v46 = vld [vmem:[#allocation8 + $0x50] sm:$0xff]  }
 0x102   :  { %1400 = vmatprep.subr.bf16.mxu0 %v2998_v48  ;;  %1523 = vmatprep.subr.bf16.mxu1 %v3001_v49  ;;  %v3135_v47 = vld [vmem:[#allocation8 + $0x10] sm:$0xff]   ;;  %v3136_v48 = vld [vmem:[#allocation8 + $0x58] sm:$0xff]  }
 0x103   :  { %v3137_v49 = vld [vmem:[#allocation8 + $0x18] sm:$0xff]  }
 0x105   :  { %1401 = vmatpush1.bf16.msra.mxu0 %v2996_v50  ;;  %1524 = vmatpush1.bf16.msra.mxu1 %v2999_v51  ;;  %v3138_v50 = vld [vmem:[#allocation8 + $0x60] sm:$0xff]  }
 0x106   :  { %1402 = vmatprep.subr.bf16.mxu0 %v3004_v52  ;;  %1525 = vmatprep.subr.bf16.mxu1 %v3007_v53  ;;  %v3139_v51 = vld [vmem:[#allocation8 + $0x20] sm:$0xff]   ;;  %v3140_v52 = vld [vmem:[#allocation8 + $0x68] sm:$0xff]  }
 0x107   :  { %v3141_v53 = vld [vmem:[#allocation8 + $0x28] sm:$0xff]  }
 0x109   :  { %1403 = vmatpush1.bf16.msra.mxu0 %v3002_v54  ;;  %1526 = vmatpush1.bf16.msra.mxu1 %v3005_v55  ;;  %v297_v54 = vlaneseq }
 0x10a   :  { %1404 = vmatprep.subr.bf16.mxu0 %v3010_v56  ;;  %1527 = vmatprep.subr.bf16.mxu1 %v3013_v57  ;;  %v3458_v57 = vld [vmem:[%s3504_s2] sm:$0xf] }
 0x10b   :  { %v3452_v55 = vshrl.u32 %v297_v54, 7 }
 0x10d   :  { %1405 = vmatpush1.bf16.msra.mxu0 %v3008_v58  ;;  %1528 = vmatpush1.bf16.msra.mxu1 %v3011_v59  ;;  %v299_v56 = vsub.s32 0, %v3452_v55  ;;  %v303_v58 = vsub.s32 1, %v3452_v55  ;;  %v311_v59 = vsub.s32 3, %v3452_v55 }
 0x10e   :  { %1406 = vmatprep.subr.bf16.mxu0 %v3016_v60  ;;  %1529 = vmatprep.subr.bf16.mxu1 %v3019_v61 }
 0x10f   :  { %v300_v60 = vrot.slane %v3458_v57, %v299_v56  ;;  %v304_v61 = vrot.slane %v3458_v57, %v303_v58 }
 0x111   :  { %1407 = vmatpush1.bf16.msra.mxu0 %v3014_v62  ;;  %1530 = vmatpush1.bf16.msra.mxu1 %v3017_v63  ;;  %v312_v62 = vrot.slane %v3458_v57, %v311_v59  ;;  %v3145_v59 = vld [vmem:[#allocation8 + $0x38] sm:$0xff]  }
 0x112   :  { %1408 = vmatprep.subr.bf16.mxu0 %v3022_v0  ;;  %1531 = vmatprep.subr.bf16.mxu1 %v3025_v1 }
 0x115   :  { %1409 = vmatpush1.bf16.msra.mxu0 %v3020_v2  ;;  %1532 = vmatpush1.bf16.msra.mxu1 %v3023_v3 }
 0x116   :  { %1410 = vmatprep.subr.bf16.mxu0 %v3028_v4  ;;  %1533 = vmatprep.subr.bf16.mxu1 %v3031_v5 }
 0x119   :  { %1411 = vmatpush1.bf16.msra.mxu0 %v3026_v6  ;;  %1534 = vmatpush1.bf16.msra.mxu1 %v3029_v7 }
 0x11a   :  { %1948 = vmatprep.subr.bf16.mxu0 %v3036_v8  ;;  %2649 = vmatprep.subr.bf16.mxu1 %v3130_v42  ;;  %v3123_v42 = vld [vmem:[#allocation7 + $0x1d4] ss:$8 sps:$4 sm:$0xff]  }
 0x11c   :  { %1413 = vmatmul.mubr.bf16.vlgmr.msra.gmra.mrb[0].mxu0 %v2365_v9  ;;  %1536 = vmatmul.mubr.bf16.vlgmr.msra.gmra.mrb[0].mxu1 %v2365_v9 }
 0x11d   :  { %1949 = vmatpush1.bf16.msra.mxu0 %v3034_v10  ;;  %2650 = vmatpush3.bf16.msra.mxu1 %v3131_v43  ;;  %v3121_v43 = vld [vmem:[#allocation7 + $0x1d0] ss:$8 sps:$4 sm:$0xff]  }
 0x11e   :  { %1950 = vmatprep.subr.bf16.mxu0 %v3039_v12  ;;  %2651 = vmatprep.subr.bf16.mxu1 %v3132_v44 }
 0x121   :  { %1951 = vmatpush1.bf16.msra.mxu0 %v3037_v13  ;;  %2652 = vmatpush3.bf16.msra.mxu1 %v3133_v45  ;;  %v3126_v45 = vld [vmem:[#allocation7 + $0x1e4] ss:$8 sps:$4 sm:$0xff]  }
 0x122   :  { %1952 = vmatprep.subr.bf16.mxu0 %v3042_v14  ;;  %2653 = vmatprep.subr.bf16.mxu1 %v3134_v46  ;;  %v3124_v46 = vld [vmem:[#allocation7 + $0x1e0] ss:$8 sps:$4 sm:$0xff]  }
 0x125   :  { %1953 = vmatpush1.bf16.msra.mxu0 %v3040_v15  ;;  %2654 = vmatpush3.bf16.msra.mxu1 %v3135_v47  ;;  %v3082_v15 = vld [vmem:[#allocation7 + $0x100] ss:$8 sps:$4 sm:$0xff]  }
 0x126   :  { %1954 = vmatprep.subr.bf16.mxu0 %v3045_v16  ;;  %2655 = vmatprep.subr.bf16.mxu1 %v3136_v48  ;;  %v3129_v48 = vld [vmem:[#allocation7 + $0x1f4] ss:$8 sps:$4 sm:$0xff]  }
 0x129   :  { %1955 = vmatpush1.bf16.msra.mxu0 %v3043_v17  ;;  %2656 = vmatpush3.bf16.msra.mxu1 %v3137_v49  ;;  %v3087_v17 = vld [vmem:[#allocation7 + $0x114] ss:$8 sps:$4 sm:$0xff]   ;;  %v3127_v49 = vld [vmem:[#allocation7 + $0x1f0] ss:$8 sps:$4 sm:$0xff]  }
 0x12a   :  { %1956 = vmatprep.subr.bf16.mxu0 %v3048_v18  ;;  %2657 = vmatprep.subr.bf16.mxu1 %v3138_v50 }
 0x12d   :  { %1957 = vmatpush1.bf16.msra.mxu0 %v3046_v11  ;;  %2658 = vmatpush3.bf16.msra.mxu1 %v3139_v51  ;;  %v3085_v11 = vld [vmem:[#allocation7 + $0x110] ss:$8 sps:$4 sm:$0xff]  }
 0x12e   :  { %1958 = vmatprep.subr.bf16.mxu0 %v3051_v19  ;;  %2659 = vmatprep.subr.bf16.mxu1 %v3140_v52  ;;  %v3090_v19 = vld [vmem:[#allocation7 + $0x124] ss:$8 sps:$4 sm:$0xff]   ;;  %v3142_v52 = vld [vmem:[#allocation8 + $0x70] sm:$0xff]  }
 0x131   :  { %1959 = vmatpush1.bf16.msra.mxu0 %v3049_v20  ;;  %2660 = vmatpush3.bf16.msra.mxu1 %v3141_v53  ;;  %v3088_v20 = vld [vmem:[#allocation7 + $0x120] ss:$8 sps:$4 sm:$0xff]   ;;  %v3143_v53 = vld [vmem:[#allocation8 + $0x30] sm:$0xff]  }
 0x132   :  { %1960 = vmatprep.subr.bf16.mxu0 %v3054_v21  ;;  %v3093_v21 = vld [vmem:[#allocation7 + $0x134] ss:$8 sps:$4 sm:$0xff]   ;;  %2661 = vmatprep.subr.bf16.mxu1 %v3142_v52 }
 0x135   :  { %1961 = vmatpush1.bf16.msra.mxu0 %v3052_v22  ;;  %v3091_v22 = vld [vmem:[#allocation7 + $0x130] ss:$8 sps:$4 sm:$0xff]   ;;  %2662 = vmatpush3.bf16.msra.mxu1 %v3143_v53 }
 0x136   :  { %1962 = vmatprep.subr.bf16.mxu0 %v3057_v23  ;;  %v3096_v23 = vld [vmem:[#allocation7 + $0x144] ss:$8 sps:$4 sm:$0xff]  }
 0x139   :  { %1963 = vmatpush1.bf16.msra.mxu0 %v3055_v24  ;;  %v3094_v24 = vld [vmem:[#allocation7 + $0x140] ss:$8 sps:$4 sm:$0xff]  }
 0x13a   :  { %1964 = vmatprep.subr.bf16.mxu0 %v3060_v25  ;;  %v3099_v25 = vld [vmem:[#allocation7 + $0x154] ss:$8 sps:$4 sm:$0xff]  }
 0x13d   :  { %1965 = vmatpush1.bf16.msra.mxu0 %v3058_v26  ;;  %v3097_v26 = vld [vmem:[#allocation7 + $0x150] ss:$8 sps:$4 sm:$0xff]  }
 0x13e   :  { %1966 = vmatprep.subr.bf16.mxu0 %v3063_v27  ;;  %v3102_v27 = vld [vmem:[#allocation7 + $0x164] ss:$8 sps:$4 sm:$0xff]  }
 0x141   :  { %1967 = vmatpush1.bf16.msra.mxu0 %v3061_v28  ;;  %v3100_v28 = vld [vmem:[#allocation7 + $0x160] ss:$8 sps:$4 sm:$0xff]  }
 0x142   :  { %1968 = vmatprep.subr.bf16.mxu0 %v3066_v29  ;;  %v3105_v29 = vld [vmem:[#allocation7 + $0x174] ss:$8 sps:$4 sm:$0xff]  }
 0x145   :  { %1969 = vmatpush1.bf16.msra.mxu0 %v3064_v30  ;;  %v3103_v30 = vld [vmem:[#allocation7 + $0x170] ss:$8 sps:$4 sm:$0xff]  }
 0x146   :  { %1970 = vmatprep.subr.bf16.mxu0 %v3069_v31  ;;  %v3108_v31 = vld [vmem:[#allocation7 + $0x184] ss:$8 sps:$4 sm:$0xff]  }
 0x149   :  { %1971 = vmatpush1.bf16.msra.mxu0 %v3067_v32  ;;  %v3106_v32 = vld [vmem:[#allocation7 + $0x180] ss:$8 sps:$4 sm:$0xff]  }
 0x14a   :  { %1972 = vmatprep.subr.bf16.mxu0 %v3072_v33  ;;  %v3111_v33 = vld [vmem:[#allocation7 + $0x194] ss:$8 sps:$4 sm:$0xff]  }
 0x14d   :  { %1973 = vmatpush1.bf16.msra.mxu0 %v3070_v34  ;;  %v3109_v34 = vld [vmem:[#allocation7 + $0x190] ss:$8 sps:$4 sm:$0xff]  }
 0x14e   :  { %1974 = vmatprep.subr.bf16.mxu0 %v3075_v35  ;;  %v3114_v35 = vld [vmem:[#allocation7 + $0x1a4] ss:$8 sps:$4 sm:$0xff]  }
 0x151   :  { %1975 = vmatpush1.bf16.msra.mxu0 %v3073_v36  ;;  %v3112_v36 = vld [vmem:[#allocation7 + $0x1a0] ss:$8 sps:$4 sm:$0xff]  }
 0x152   :  { %1976 = vmatprep.subr.bf16.mxu0 %v3078_v37  ;;  %v3117_v37 = vld [vmem:[#allocation7 + $0x1b4] ss:$8 sps:$4 sm:$0xff]  }
 0x155   :  { %1977 = vmatpush1.bf16.msra.mxu0 %v3076_v38  ;;  %v3115_v38 = vld [vmem:[#allocation7 + $0x1b0] ss:$8 sps:$4 sm:$0xff]  }
 0x156   :  { %1978 = vmatprep.subr.bf16.mxu0 %v3081_v39  ;;  %v3120_v39 = vld [vmem:[#allocation7 + $0x1c4] ss:$8 sps:$4 sm:$0xff]  }
 0x159   :  { %1979 = vmatpush1.bf16.msra.mxu0 %v3079_v40  ;;  %v3118_v40 = vld [vmem:[#allocation7 + $0x1c0] ss:$8 sps:$4 sm:$0xff]  }
 0x15a   :  { %1989 = vmatprep.subr.bf16.mxu0 %v3084_v41  ;;  %v307_v41 = vsub.s32 2, %v3452_v55  ;;  %v3149_v55 = vld [vmem:[#allocation10 + $0x18] sm:$0xff]  }
 0x15c   :  { %v308_v44 = vrot.slane %v3458_v57, %v307_v41  ;;  %v3144_v57 = vld [vmem:[#allocation8 + $0x78] sm:$0xff]  }
 0x15d   :  { %2663 = vmatprep.subr.bf16.mxu1 %v3144_v57 }
 0x15e   :  { %2664 = vmatpush3.bf16.msra.mxu1 %v3145_v59 }
 0x1ef   :  { %v1414_v63 = vpop.f32.mrb[0].mxu0  ;;  %v3469_v0 = vpop.f32.mrb[0].mxu1 }
 0x1f0   :  { %v2700_v1 = vadd.f32 %v1414_v63, %v300_v60  ;;  %v1416_v2 = vpop.f32.mrb[1].mxu0  ;;  %v1539_v3 = vpop.f32.mrb[1].mxu1  ;;  %v2702_v47 = vadd.f32 %v3469_v0, %v308_v44  ;;  %v3313_v60 = vmov 0.0  }
 0x1f1   :  { %v2701_v4 = vadd.f32 %v1416_v2, %v304_v61  ;;  %v2703_v5 = vadd.f32 %v1539_v3, %v312_v62  ;;  %v1418_v6 = vpop.f32.mrb[2].mxu0  ;;  %v1541_v7 = vpop.f32.mrb[2].mxu1  ;;  %2680 = vmatprep.subr.bf16.mxu1 %v3313_v60  ;;  %v1616_v61 = vld [vmem:[%s3506_s4] sm:$0x3] }
 0x1f2   :  { %v1544_v8 = vmax.f32 %v2700_v1, 0.0  ;;  %v1419_v9 = vpop.f32.mrb[3].mxu0  ;;  %v1542_v10 = vpop.f32.mrb[3].mxu1  ;;  %v1546_v50 = vmax.f32 %v2702_v47, 0.0  ;;  %v1621_v62 = vrot.slane %v1616_v61, %v299_v56  ;;  %v1625_v63 = vrot.slane %v1616_v61, %v303_v58  ;;  %v3148_v56 = vld [vmem:[#allocation10 + $0x10] sm:$0xff]   ;;  %v3150_v58 = vld [vmem:[#allocation10 + $0x20] sm:$0xff]  }
 0x1f3   :  { %v1545_v12 = vmax.f32 %v2701_v4, 0.0  ;;  %v1547_v13 = vmax.f32 %v2703_v5, 0.0  ;;  %v3146_v9 = vld [vmem:[#allocation10] sm:$0xff]  }
 0x1f4   :  { %v1548_v16 = vpack.c.bf16 %v1544_v8, %v1544_v8  ;;  %v1550_v51 = vpack.c.bf16 %v1546_v50, %v1546_v50 }
 0x1f5   :  { %v1549_v14 = vpack.c.bf16 %v1545_v12, %v1545_v12  ;;  %v1551_v18 = vpack.c.bf16 %v1547_v13, %v1547_v13  ;;  %v3147_v12 = vld [vmem:[#allocation10 + $0x8] sm:$0xff]  }
 0x1f6   :  { %v3151_v13 = vld [vmem:[#allocation10 + $0x28] sm:$0xff]  }
 0x1f7   :  { %1980 = vmatprep.mubr.bf16.mxu0 %v1549_v14  ;;  %v3152_v14 = vld [vmem:[#allocation10 + $0x30] sm:$0xff]  }
 0x1f8   :  { %1981 = vmatmul.mubr.bf16.vlgmr.msra.gmra.mrb[4].mxu0 %v1548_v16 }
 0x1f9   :  { %1990 = vmatpush1.bf16.msra.mxu0 %v3082_v15  ;;  %2021 = vmatprep.mubr.bf16.mxu0 %v1551_v18  ;;  %v3153_v15 = vld [vmem:[#allocation10 + $0x38] sm:$0xff]  }
 0x1fa   :  { %1991 = vmatprep.subr.bf16.mxu0 %v3087_v17  ;;  %v2623_v17 = vld [vmem:[%s3508_s6] ss:$0 sm:$0xff]  ;;  %s3315_s6 = smov [#allocation11]  }
 0x1fd   :  { %1992 = vmatpush1.bf16.msra.mxu0 %v3085_v11 }
 0x1fe   :  { %1993 = vmatprep.subr.bf16.mxu0 %v3090_v19 }
 0x201   :  { %1994 = vmatpush1.bf16.msra.mxu0 %v3088_v20 }
 0x202   :  { %1995 = vmatprep.subr.bf16.mxu0 %v3093_v21 }
 0x205   :  { %1996 = vmatpush1.bf16.msra.mxu0 %v3091_v22 }
 0x206   :  { %1997 = vmatprep.subr.bf16.mxu0 %v3096_v23 }
 0x209   :  { %1998 = vmatpush1.bf16.msra.mxu0 %v3094_v24  ;;  %v2323_v24 = vand.u32 127, %v297_v54 }
 0x20a   :  { %1999 = vmatprep.subr.bf16.mxu0 %v3099_v25  ;;  %v2640_v25 = vld [vmem:[%s3510_s8] ss:$0 sm:$0xff]  ;;  %s2350_s8 = sshll.u32 %s3315_s6, 4  ;;  %s2351_s8 = int_to_ptr.vmem [resolvable:$true] %s2350_s8 }
 0x20b   :  { %vm2324_vm1 = vcmp.lt.s32.totalorder %v2323_v24, 10  ;;  %s3272_s12 = scalar_lea.vmem %s2351_s8, 128  ;;  %p3277_p13 = scmp.lt.s32.totalorder %s2351_s8, %s2351_s8 }
 0x20c   :  { %p3273_p12 = scmp.ne.s32.totalorder %s2351_s8, %s3272_s12  ;;  %p3278_p0 = scmp.lt.s32.totalorder %s3272_s12, %s3272_s12 }
 0x20d   :  { %2000 = vmatpush1.bf16.msra.mxu0 %v3097_v26 }
 0x20e   :  { %2001 = vmatprep.subr.bf16.mxu0 %v3102_v27  ;;  %p3279_p1 = por %p3278_p0, %p3277_p13 }
 0x210   :  { %p3280_p2 = pnand %p3279_p1, %p3273_p12 }
 0x211   :  { %2002 = vmatpush1.bf16.msra.mxu0 %v3100_v28 }
 0x212   :  { %2003 = vmatprep.subr.bf16.mxu0 %v3105_v29 }
 0x215   :  { %2004 = vmatpush1.bf16.msra.mxu0 %v3103_v30 }
 0x216   :  { %2005 = vmatprep.subr.bf16.mxu0 %v3108_v31 }
 0x219   :  { %2006 = vmatpush1.bf16.msra.mxu0 %v3106_v32 }
 0x21a   :  { %2007 = vmatprep.subr.bf16.mxu0 %v3111_v33 }
 0x21d   :  { %2008 = vmatpush1.bf16.msra.mxu0 %v3109_v34 }
 0x21e   :  { %2009 = vmatprep.subr.bf16.mxu0 %v3114_v35 }
 0x221   :  { %2010 = vmatpush1.bf16.msra.mxu0 %v3112_v36 }
 0x222   :  { %2011 = vmatprep.subr.bf16.mxu0 %v3117_v37 }
 0x225   :  { %2012 = vmatpush1.bf16.msra.mxu0 %v3115_v38 }
 0x226   :  { %2013 = vmatprep.subr.bf16.mxu0 %v3120_v39 }
 0x229   :  { %2014 = vmatpush1.bf16.msra.mxu0 %v3118_v40 }
 0x22a   :  { %2015 = vmatprep.subr.bf16.mxu0 %v3123_v42 }
 0x22d   :  { %2016 = vmatpush1.bf16.msra.mxu0 %v3121_v43 }
 0x22e   :  { %2017 = vmatprep.subr.bf16.mxu0 %v3126_v45 }
 0x231   :  { %2018 = vmatpush1.bf16.msra.mxu0 %v3124_v46 }
 0x232   :  { %2019 = vmatprep.subr.bf16.mxu0 %v3129_v48 }
 0x235   :  { %2020 = vmatpush1.bf16.msra.mxu0 %v3127_v49 }
 0x238   :  { %2022 = vmatmul.mubr.bf16.vlgmr.msra.gmra.mrb[4].mxu0 %v1550_v51 }
 0x30b   :  { %v2023_v0 = vpop.f32.mrb[4].mxu0 }
 0x30c   :  { %v2704_v1 = vadd.f32 %v2023_v0, %v1621_v62  ;;  %v2025_v2 = vpop.f32.mrb[5].mxu0 }
 0x30d   :  { %v2705_v3 = vadd.f32 %v2025_v2, %v1625_v63  ;;  %v2027_v4 = vpop.f32.mrb[6].mxu0 }
 0x30e   :  { %v2030_v5 = vmax.f32 %v2704_v1, 0.0  ;;  %v2028_v6 = vpop.f32.mrb[7].mxu0 }
 0x30f   :  { %v2031_v7 = vmax.f32 %v2705_v3, 0.0 }
 0x310   :  { %v2032_v10 = vpack.c.bf16 %v2030_v5, %v2030_v5 }
 0x311   :  { %v2033_v8 = vpack.c.bf16 %v2031_v7, %v2031_v7 }
 0x313   :  { %2201 = vmatprep.mubr.bf16.mxu1 %v2033_v8 }
 0x314   :  { %2202 = vmatmul.mubr.bf16.vlgmr.msra.gmra.mrb[4].mxu1 %v2032_v10 }
 0x315   :  { %2681 = vmatpush3.bf16.msra.mxu1 %v3146_v9  ;;  %2696 = vmatprep.mubr.msk.bf16.mxu1 %vm3314_vm0, %v3313_v60 }
 0x316   :  { %2682 = vmatprep.subr.bf16.mxu1 %v3313_v60 }
 0x319   :  { %2683 = vmatpush3.bf16.msra.mxu1 %v3147_v12 }
 0x31a   :  { %2684 = vmatprep.subr.bf16.mxu1 %v3313_v60 }
 0x31d   :  { %2685 = vmatpush3.bf16.msra.mxu1 %v3148_v56 }
 0x31e   :  { %2686 = vmatprep.subr.bf16.mxu1 %v3313_v60 }
 0x321   :  { %2687 = vmatpush3.bf16.msra.mxu1 %v3149_v55 }
 0x322   :  { %2688 = vmatprep.subr.bf16.mxu1 %v3313_v60 }
 0x325   :  { %2689 = vmatpush3.bf16.msra.mxu1 %v3150_v58 }
 0x326   :  { %2690 = vmatprep.subr.bf16.mxu1 %v3313_v60 }
 0x329   :  { %2691 = vmatpush3.bf16.msra.mxu1 %v3151_v13 }
 0x32a   :  { %2692 = vmatprep.subr.bf16.mxu1 %v3313_v60 }
 0x32d   :  { %2693 = vmatpush3.bf16.msra.mxu1 %v3152_v14 }
 0x32e   :  { %2694 = vmatprep.subr.bf16.mxu1 %v3313_v60 }
 0x331   :  { %2695 = vmatpush3.bf16.msra.mxu1 %v3153_v15 }
 0x3e7   :  { %v2665_v16 = vpop.f32.mrb[4].mxu1 }
 0x3e8   :  { %v2666_v18 = vpop.f32.mrb[5].mxu1 }
 0x3e9   :  { %v2667_v11 = vadd.f32 %v2666_v18, %v2665_v16  ;;  %v2668_v19 = vpop.f32.mrb[6].mxu1 }
 0x3ea   :  { %v2669_v20 = vpop.f32.mrb[7].mxu1 }
 0x3eb   :  { %v2204_v21 = vadd.f32 %v2667_v11, %v2623_v17 }
 0x3ed   :  { %v2209_v22 = vmax.f32 %v2204_v21, 0.0 }
 0x3ef   :  { %v2210_v23 = vpack.c.bf16 %v2209_v22, %v2209_v22 }
 0x3f1   :  { %2697 = vmatmul.mubr.bf16.vlgmr.msra.gmra.mrb[8].mxu1 %v2210_v23 }
 0x4c4   :  { %v2316_v26 = vpop.f32.mrb[8].mxu1 }
 0x4c5   :  { %v2317_v27 = vadd.f32 %v2640_v25, %v2316_v26  ;;  %v2698_v28 = vpop.f32.mrb[9].mxu1 }
 0x4c6   :  { %v2319_v29 = vpop.f32.mrb[10].mxu1 }
 0x4c7   :  { %v2699_v30 = vpop.f32.mrb[11].mxu1  ;;  %v2325_v31 = vsel %vm2324_vm1, %v2317_v27, -inf }
 0x4c8   :  { %2326 = vmax.xlane.f32.xlu0 %v2325_v31 }
 0x555   :  { %v2327_v32 = vpop.xlane.xlu0 %2326 }
 0x556   :  { %v2328_v33 = vsub.f32 %v2325_v31, %v2327_v32 }
 0x558   :  { %v2329_v34 = vmul.f32 1.442695, %v2328_v33 }
 0x55a   :  { %3154 = vpow2.f32 %v2329_v34 }
 0x564   :  { %v3155_v35 = vpop.eup %3154 }
 0x565   :  { %2331 = vadd.xlane.f32.xlu0 %v3155_v35 }
 0x5f2   :  { %v2332_v54 = vpop.xlane.xlu0 %2331 }
 0x5f3   :  { %3156 = vrcp.f32 %v2332_v54 }
 0x5fd   :  { %v3157_v36 = vpop.eup %3156 }
 0x5fe   :  { %v2334_v37 = vmul.f32 %v3157_v36, %v3155_v35 }
 0x600   :  { %v2335_v38 = vmul.f32 1.442695, %v2334_v37 }
 0x602   :  { %3158 = vpow2.f32 %v2335_v38 }
 0x60c   :  { %v3159_v39 = vpop.eup %3158 }
 0x60d   :  { %v2337_v40 = vsel %vm2324_vm1, %v3159_v39, 0.0 }
 0x60e   :  { %2338 = vadd.xlane.f32.xlu1 %v2337_v40 }
 0x69b   :  { %v2339_v41 = vpop.xlane.xlu1 %2338 }
 0x69c   :  { %3160 = vlog2.f32 %v2339_v41 }
 0x6a6   :  { %v3161_v42 = vpop.eup %3160 }
 0x6a7   :  { %v2341_v43 = vmul.f32 0.6931472, %v3161_v42 }
 0x6a9   :  { %v2342_v44 = vsub.f32 %v2334_v37, %v2341_v43 }
 0x6ab   :  { %2343 = vst [vmem:[#allocation11] sm:$0xff] %v2342_v44 }
 0x6ac   :  { %3283 = shalt.err (!%p3280_p2)
}
 0x6ad   :  { %s3284_s15 = scalar_lea.hbm %s3511_s9, 128 }
 0x6ae   :  { %p3285_p3 = scmp.ne.s32.totalorder %s3511_s9, %s3284_s15  ;;  %p3288_p4 = scmp.lt.u32.totalorder %s3284_s15, %s3511_s9 }
 0x6b0   :  { %p3290_p5 = pnand %p3288_p4, %p3285_p3 }
 0x6b2   :  { %3293 = shalt.err (!%p3290_p5)
}
 0x6b3   :  { %2353 = dma.vmem_to_hbm [thread:$0]  %s2351_s8, 128, %s3511_s9, [#allocation4]  }
 0x6b4   :  { %3300 = dma.done.wait [#allocation4], 128  }
 0x6b5   :  { %3301 = vsyncadd [#allocation4], 4294967168 }
 0x6b6   :  { %2357 = vsyncpa [#allocation3], 1 }
 0x6b7   :  { %2358 = vsyncpa [#allocation6], 1 }
 0x6b8   :  { %2359 = vsyncpa [#allocation9], 1 }
 0x6b9   :  { %2360 = vsyncpa [#allocation4], 1 }

</bundles_post_ra>
